<compile_context>
chip_gen: v7x
topology: tpu7x:2x2x1
jax: 0.10.0
libtpu: 0.0.40
codegen_flags: <defaults>
</compile_context>

<pallas_src>
import functools

import jax
import jax.numpy as jnp
import numpy as np
from jax.experimental import pallas as pl
from jax.experimental.pallas import tpu as pltpu


# ----------------------------------------------------------------------------
# Kernel 1: fused LeakyReLU -> Conv(4,2,1) -> ReLU -> ConvTranspose(4,2,1)
#           + per-image BatchNorm partial sums.  One image per grid step.
# ----------------------------------------------------------------------------
def _down_up_kernel(xs_ref, wd_ref, wu_ref, u_ref, st_ref, hpad_ref, *, Hi, Wi):
    # xs_ref:  (1, Hi+1, Wi+1, 4*C)   padded + space-to-depth input (one image)
    # wd_ref:  (4, 4*C, Ci)           down-conv weights, one (4C, Ci) per 2x2 tap
    # wu_ref:  (16, Ci, Co)           up-conv weights per (parity r,s, tap dt,dv)
    # u_ref:   (1, Co, 4*Hi*Wi)       conv-transpose output, parity-class columns
    # st_ref:  (1, 2, Co)             per-image (sum, sum of squares) per channel
    # hpad_ref: VMEM scratch (Hi+2, Wi+2, Ci) zero-bordered h
    C4 = xs_ref.shape[3]
    Ci = wd_ref.shape[2]
    Co = wu_ref.shape[2]
    HWi = Hi * Wi

    xs = xs_ref[0]                                   # (Hi+1, Wi+1, 4C)
    a = jnp.where(xs > 0, xs, 0.2 * xs)              # LeakyReLU(0.2), once per element

    # ---- down conv: 4 unit-stride taps over the space-to-depth input ----
    h = jnp.zeros((HWi, Ci), jnp.float32)
    for t, (dh, dw) in enumerate(((0, 0), (0, 1), (1, 0), (1, 1))):
        slab = a[dh:dh + Hi, dw:dw + Wi, :].reshape(HWi, C4)
        h = h + jnp.dot(slab, wd_ref[t], preferred_element_type=jnp.float32)
    h = jnp.maximum(h, 0.0)                          # ReLU

    # ---- zero-padded h kept in VMEM (no HBM round trip, no col2im scatter) --
    hpad_ref[...] = jnp.zeros((Hi + 2, Wi + 2, Ci), jnp.float32)
    hpad_ref[1:1 + Hi, 1:1 + Wi, :] = h.reshape(Hi, Wi, Ci)

    # ---- transposed conv, output-stationary per output parity class (r, s) --
    # u[co, 2a+r, 2b+s] = sum_{dt,dv,ci} h_pad[a+r+dt, b+s+dv, ci]
    #                                    * w_up[ci, co, 3-r-2dt, 3-s-2dv]
    s_acc = jnp.zeros((1, Co), jnp.float32)
    ss_acc = jnp.zeros((1, Co), jnp.float32)
    for r in range(2):
        for s in range(2):
            acc = jnp.zeros((HWi, Co), jnp.float32)
            for dt in range(2):
                for dv in range(2):
                    slab = hpad_ref[r + dt:r + dt + Hi, s + dv:s + dv + Wi, :]
                    slab = slab.reshape(HWi, Ci)
                    wtap = wu_ref[((r * 2 + s) * 2 + dt) * 2 + dv]
                    acc = acc + jnp.dot(slab, wtap,
                                        preferred_element_type=jnp.float32)
            cls = r * 2 + s
            # lane-dense store of this parity class's columns
            u_ref[0, :, cls * HWi:(cls + 1) * HWi] = acc.T
            s_acc = s_acc + jnp.sum(acc, axis=0, keepdims=True)
            ss_acc = ss_acc + jnp.sum(acc * acc, axis=0, keepdims=True)

    st_ref[0] = jnp.concatenate([s_acc, ss_acc], axis=0)   # (2, Co), one store


# ----------------------------------------------------------------------------
# Kernel 2: BatchNorm apply + skip concat, written lane-dense into the
#           (N, 2C, H*W) output slab (x into rows [0,C), y into rows [C,2C)).
# ----------------------------------------------------------------------------
def _bn_concat_kernel(x_ref, u_ref, sc_ref, sh_ref, o_ref):
    # x_ref: (1, C, HW)  u_ref: (1, Co, HW)  sc/sh: (Co, 1)  o_ref: (1, C+Co, HW)
    C = x_ref.shape[1]
    Co = u_ref.shape[1]
    o_ref[0, 0:C, :] = x_ref[0]
    o_ref[0, C:C + Co, :] = u_ref[0] * sc_ref[...] + sh_ref[...]


# ----------------------------------------------------------------------------
# Host-side (cheap, single-pass) relayouts: padding + space-to-depth of x and
# static weight reshuffles.  No patch-matrix inflation.
# ----------------------------------------------------------------------------
def _space_to_depth_pad(x):
    # x: (N, C, H, W) -> (N, H/2+1, W/2+1, 4*C); channel index = (ph*2+pw)*C+ci
    N, C, H, W = x.shape
    xp = jnp.pad(x, ((0, 0), (0, 0), (1, 1), (1, 1)))
    Hs, Ws = (H + 2) // 2, (W + 2) // 2
    xs = xp.reshape(N, C, Hs, 2, Ws, 2)
    xs = xs.transpose(0, 2, 4, 3, 5, 1).reshape(N, Hs, Ws, 4 * C)
    return xs


def _reorg_down_weight(w):
    # w: (Co, Ci, 4, 4) [Conv2d OIHW] -> (4, 4*Ci, Co); tap = dh*2+dw,
    # channel index = (ph*2+pw)*Ci + ci  (kh = 2*dh+ph, kw = 2*dw+pw)
    Co, Ci = w.shape[0], w.shape[1]
    w6 = w.reshape(Co, Ci, 2, 2, 2, 2)              # (co, ci, dh, ph, dw, pw)
    w6 = jnp.transpose(w6, (2, 4, 3, 5, 1, 0))      # (dh, dw, ph, pw, ci, co)
    return w6.reshape(4, 4 * Ci, Co)


def _reorg_up_weight(w):
    # w: (Ci, Co, 4, 4) [ConvTranspose2d IOHW] -> (16, Ci, Co) indexed by
    # ((r*2+s)*2+dt)*2+dv with kh = 3-r-2*dt, kw = 3-s-2*dv
    Ci, Co = w.shape[0], w.shape[1]
    r = np.arange(2)[:, None]
    dt = np.arange(2)[None, :]
    k_idx = 3 - r - 2 * dt                          # (2, 2): [r, dt] -> kh
    wg = w[:, :, k_idx, :]                          # (Ci, Co, r, dt, kw)
    wg = wg[:, :, :, :, k_idx]                      # (Ci, Co, r, dt, s, dv)
    wg = jnp.transpose(wg, (2, 4, 3, 5, 0, 1))      # (r, s, dt, dv, ci, co)
    return wg.reshape(16, Ci, Co)


# ----------------------------------------------------------------------------
# Module forward (innermost UnetSkipConnectionBlock, norm_layer=BatchNorm2d)
# ----------------------------------------------------------------------------
def unet_innermost_forward(x, params):
    N, C, H, W = x.shape
    assert H % 2 == 0 and W % 2 == 0
    wd = params["down_w"]                      # (inner_nc, input_nc, 4, 4)
    wu = params["up_w"]                        # (inner_nc, outer_nc, 4, 4)
    gamma, beta = params["bn_gamma"], params["bn_beta"]
    Ci, Co = wd.shape[0], wu.shape[1]
    Hi, Wi = H // 2, W // 2
    HW = H * W

    xs2d = _space_to_depth_pad(x)              # (N, Hi+1, Wi+1, 4C)
    wd_g = _reorg_down_weight(wd)              # (4, 4C, Ci)
    wu_g = _reorg_up_weight(wu)                # (16, Ci, Co)

    u_par, stats = pl.pallas_call(
        functools.partial(_down_up_kernel, Hi=Hi, Wi=Wi),
        grid=(N,),
        in_specs=[
            pl.BlockSpec((1, Hi + 1, Wi + 1, 4 * C), lambda n: (n, 0, 0, 0)),
            pl.BlockSpec((4, 4 * C, Ci), lambda n: (0, 0, 0)),
            pl.BlockSpec((16, Ci, Co), lambda n: (0, 0, 0)),
        ],
        out_specs=[
            pl.BlockSpec((1, Co, 4 * Hi * Wi), lambda n: (n, 0, 0)),
            pl.BlockSpec((1, 2, Co), lambda n: (n, 0, 0)),
        ],
        out_shape=[
            jax.ShapeDtypeStruct((N, Co, 4 * Hi * Wi), jnp.float32),
            jax.ShapeDtypeStruct((N, 2, Co), jnp.float32),
        ],
        scratch_shapes=[pltpu.VMEM((Hi + 2, Wi + 2, Ci), jnp.float32)],
        compiler_params=pltpu.CompilerParams(dimension_semantics=("parallel",)),
    )(xs2d, wd_g, wu_g)

    # Parity-class layout -> standard (N, Co, H*W).  Single cheap XLA relayout
    # of the (small) u tensor; everything heavier stayed in VMEM.
    u_std = (u_par.reshape(N, Co, 2, 2, Hi, Wi)
                  .transpose(0, 1, 4, 2, 5, 3)
                  .reshape(N, Co, HW))

    # BatchNorm (train mode, biased variance) finalize from per-image partials.
    cnt = float(N * HW)
    tot = jnp.sum(stats[:, 0, :], axis=0)
    tot_sq = jnp.sum(stats[:, 1, :], axis=0)
    mean = tot / cnt
    var = tot_sq / cnt - mean * mean
    scale = gamma * jax.lax.rsqrt(var + 1e-5)
    shift = beta - mean * scale

    out = pl.pallas_call(
        _bn_concat_kernel,
        grid=(N,),
        in_specs=[
            pl.BlockSpec((1, C, HW), lambda n: (n, 0, 0)),
            pl.BlockSpec((1, Co, HW), lambda n: (n, 0, 0)),
            pl.BlockSpec((Co, 1), lambda n: (0, 0)),
            pl.BlockSpec((Co, 1), lambda n: (0, 0)),
        ],
        out_specs=pl.BlockSpec((1, C + Co, HW), lambda n: (n, 0, 0)),
        out_shape=jax.ShapeDtypeStruct((N, C + Co, HW), jnp.float32),
        compiler_params=pltpu.CompilerParams(dimension_semantics=("parallel",)),
    )(x.reshape(N, C, HW), u_std, scale.reshape(Co, 1), shift.reshape(Co, 1))

    return out.reshape(N, C + Co, H, W)


# ----------------------------------------------------------------------------
# Pure-JAX reference (for correctness check)
# ----------------------------------------------------------------------------
def reference_forward(x, p):
    lrelu = jnp.where(x > 0, x, 0.2 * x)
    h = jax.lax.conv_general_dilated(
        lrelu, p["down_w"], (2, 2), ((1, 1), (1, 1)),
        dimension_numbers=("NCHW", "OIHW", "NCHW"),
        precision=jax.lax.Precision.HIGHEST)
    hr = jnp.maximum(h, 0.0)
    w_up = jnp.flip(p["up_w"], (2, 3)).transpose(1, 0, 2, 3)  # (oc, ic, kh, kw)
    u = jax.lax.conv_general_dilated(
        hr, w_up, (1, 1), ((2, 2), (2, 2)), lhs_dilation=(2, 2),
        dimension_numbers=("NCHW", "OIHW", "NCHW"),
        precision=jax.lax.Precision.HIGHEST)
    mean = jnp.mean(u, axis=(0, 2, 3), keepdims=True)
    var = jnp.mean((u - mean) ** 2, axis=(0, 2, 3), keepdims=True)
    y = (u - mean) / jnp.sqrt(var + 1e-5)
    y = y * p["bn_gamma"].reshape(1, -1, 1, 1) + p["bn_beta"].reshape(1, -1, 1, 1)
    return jnp.concatenate([x, y], axis=1)


# ----------------------------------------------------------------------------
if __name__ == "__main__":
    key = jax.random.PRNGKey(0)
    k1, k2, k3, k4, k5 = jax.random.split(key, 5)

    # innermost block: outer_nc=4, inner_nc=8, input_nc=None -> input_nc=outer_nc
    N, outer_nc, inner_nc, H, W = 2, 4, 8, 16, 16
    input_nc = outer_nc

    x = jax.random.normal(k1, (N, input_nc, H, W), jnp.float32)
    params = {
        # Conv2d(input_nc, inner_nc, 4, stride=2, padding=1, bias=False)
        "down_w": 0.1 * jax.random.normal(k2, (inner_nc, input_nc, 4, 4), jnp.float32),
        # ConvTranspose2d(inner_nc, outer_nc, 4, stride=2, padding=1, bias=False)
        "up_w": 0.1 * jax.random.normal(k3, (inner_nc, outer_nc, 4, 4), jnp.float32),
        # BatchNorm2d(outer_nc) affine params
        "bn_gamma": 1.0 + 0.1 * jax.random.normal(k4, (outer_nc,), jnp.float32),
        "bn_beta": 0.1 * jax.random.normal(k5, (outer_nc,), jnp.float32),
    }

    out = jax.block_until_ready(unet_innermost_forward(x, params))
    assert out.shape == (N, input_nc + outer_nc, H, W), out.shape

    ref = jax.block_until_ready(reference_forward(x, params))
    np.testing.assert_allclose(np.asarray(out), np.asarray(ref), rtol=1e-3, atol=1e-3)

    print("KERNEL_OK")
</pallas_src>

<mosaic_0001>
module attributes {stable_mosaic.version = 11 : i64} {
  func.func @_down_up_kernel(%arg0: i32, %arg1: memref<1x9x9x16xf32, #tpu.memory_space<vmem>>, %arg2: memref<4x16x8xf32, #tpu.memory_space<vmem>>, %arg3: memref<16x8x4xf32, #tpu.memory_space<vmem>>, %arg4: memref<1x4x256xf32, #tpu.memory_space<vmem>>, %arg5: memref<1x2x4xf32, #tpu.memory_space<vmem>>, %arg6: memref<10x10x8xf32, #tpu.memory_space<vmem>>) attributes {dimension_semantics = [#tpu.dimension_semantics<parallel>], iteration_bounds = array<i64: 2>, scalar_prefetch = 0 : i64, scratch_operands = 1 : i64, tpu.core_type = #tpu.core_type<tc>, window_params = [{transform_indices = @transform_0, window_bounds = array<i64: 1, 9, 9, 16>}, {pipeline_mode = #tpu.pipeline_mode<synchronous>, transform_indices = @transform_1, window_bounds = array<i64: 4, 16, 8>}, {pipeline_mode = #tpu.pipeline_mode<synchronous>, transform_indices = @transform_2, window_bounds = array<i64: 16, 8, 4>}, {transform_indices = @transform_3, window_bounds = array<i64: 1, 4, 256>}, {transform_indices = @transform_4, window_bounds = array<i64: 1, 2, 4>}]} {
    %c0 = arith.constant 0 : index
    %c0_0 = arith.constant 0 : index
    %c0_1 = arith.constant 0 : index
    %c0_2 = arith.constant 0 : index
    %0 = vector.load %arg1[%c0, %c0_0, %c0_1, %c0_2] : memref<1x9x9x16xf32, #tpu.memory_space<vmem>>, vector<1x9x9x16xf32>
    %1 = vector.shape_cast %0 : vector<1x9x9x16xf32> to vector<9x9x16xf32>
    %cst = arith.constant 0.000000e+00 : f32
    %2 = vector.broadcast %cst : f32 to vector<9x9x16xf32>
    %3 = arith.cmpf ogt, %1, %2 : vector<9x9x16xf32>
    %cst_3 = arith.constant 2.000000e-01 : f32
    %4 = vector.broadcast %cst_3 : f32 to vector<9x9x16xf32>
    %5 = arith.mulf %4, %1 : vector<9x9x16xf32>
    %6 = arith.select %3, %1, %5 : vector<9x9x16xi1>, vector<9x9x16xf32>
    %cst_4 = arith.constant 0.000000e+00 : f32
    %7 = vector.broadcast %cst_4 : f32 to vector<64x8xf32>
    %8 = vector.extract_strided_slice %6 {offsets = [0, 0, 0], sizes = [8, 8, 16], strides = [1, 1, 1]} : vector<9x9x16xf32> to vector<8x8x16xf32>
    %9 = vector.shape_cast %8 : vector<8x8x16xf32> to vector<64x16xf32>
    %c0_5 = arith.constant 0 : index
    %c0_6 = arith.constant 0 : index
    %c0_7 = arith.constant 0 : index
    %10 = vector.load %arg2[%c0_5, %c0_6, %c0_7] : memref<4x16x8xf32, #tpu.memory_space<vmem>>, vector<1x16x8xf32>
    %11 = vector.shape_cast %10 : vector<1x16x8xf32> to vector<16x8xf32>
    %cst_8 = arith.constant dense<0.000000e+00> : vector<64x8xf32>
    %12 = tpu.matmul %9, %11, %cst_8 {dimension_numbers = #tpu.dot_dimension_numbers<[1], [0], [0], [1], [0, 0, 1, 1], [], []>} : vector<64x16xf32>, vector<16x8xf32>, vector<64x8xf32> -> vector<64x8xf32>
    %13 = arith.addf %7, %12 : vector<64x8xf32>
    %14 = vector.extract_strided_slice %6 {offsets = [0, 1, 0], sizes = [8, 8, 16], strides = [1, 1, 1]} : vector<9x9x16xf32> to vector<8x8x16xf32>
    %15 = vector.shape_cast %14 : vector<8x8x16xf32> to vector<64x16xf32>
    %c1 = arith.constant 1 : index
    %c0_9 = arith.constant 0 : index
    %c0_10 = arith.constant 0 : index
    %16 = vector.load %arg2[%c1, %c0_9, %c0_10] : memref<4x16x8xf32, #tpu.memory_space<vmem>>, vector<1x16x8xf32>
    %17 = vector.shape_cast %16 : vector<1x16x8xf32> to vector<16x8xf32>
    %cst_11 = arith.constant dense<0.000000e+00> : vector<64x8xf32>
    %18 = tpu.matmul %15, %17, %cst_11 {dimension_numbers = #tpu.dot_dimension_numbers<[1], [0], [0], [1], [0, 0, 1, 1], [], []>} : vector<64x16xf32>, vector<16x8xf32>, vector<64x8xf32> -> vector<64x8xf32>
    %19 = arith.addf %13, %18 : vector<64x8xf32>
    %20 = vector.extract_strided_slice %6 {offsets = [1, 0, 0], sizes = [8, 8, 16], strides = [1, 1, 1]} : vector<9x9x16xf32> to vector<8x8x16xf32>
    %21 = vector.shape_cast %20 : vector<8x8x16xf32> to vector<64x16xf32>
    %c2 = arith.constant 2 : index
    %c0_12 = arith.constant 0 : index
    %c0_13 = arith.constant 0 : index
    %22 = vector.load %arg2[%c2, %c0_12, %c0_13] : memref<4x16x8xf32, #tpu.memory_space<vmem>>, vector<1x16x8xf32>
    %23 = vector.shape_cast %22 : vector<1x16x8xf32> to vector<16x8xf32>
    %cst_14 = arith.constant dense<0.000000e+00> : vector<64x8xf32>
    %24 = tpu.matmul %21, %23, %cst_14 {dimension_numbers = #tpu.dot_dimension_numbers<[1], [0], [0], [1], [0, 0, 1, 1], [], []>} : vector<64x16xf32>, vector<16x8xf32>, vector<64x8xf32> -> vector<64x8xf32>
    %25 = arith.addf %19, %24 : vector<64x8xf32>
    %26 = vector.extract_strided_slice %6 {offsets = [1, 1, 0], sizes = [8, 8, 16], strides = [1, 1, 1]} : vector<9x9x16xf32> to vector<8x8x16xf32>
    %27 = vector.shape_cast %26 : vector<8x8x16xf32> to vector<64x16xf32>
    %c3 = arith.constant 3 : index
    %c0_15 = arith.constant 0 : index
    %c0_16 = arith.constant 0 : index
    %28 = vector.load %arg2[%c3, %c0_15, %c0_16] : memref<4x16x8xf32, #tpu.memory_space<vmem>>, vector<1x16x8xf32>
    %29 = vector.shape_cast %28 : vector<1x16x8xf32> to vector<16x8xf32>
    %cst_17 = arith.constant dense<0.000000e+00> : vector<64x8xf32>
    %30 = tpu.matmul %27, %29, %cst_17 {dimension_numbers = #tpu.dot_dimension_numbers<[1], [0], [0], [1], [0, 0, 1, 1], [], []>} : vector<64x16xf32>, vector<16x8xf32>, vector<64x8xf32> -> vector<64x8xf32>
    %31 = arith.addf %25, %30 : vector<64x8xf32>
    %cst_18 = arith.constant 0.000000e+00 : f32
    %32 = vector.broadcast %cst_18 : f32 to vector<64x8xf32>
    %33 = arith.maximumf %31, %32 : vector<64x8xf32>
    %cst_19 = arith.constant 0.000000e+00 : f32
    %34 = vector.broadcast %cst_19 : f32 to vector<10x10x8xf32>
    %c0_20 = arith.constant 0 : index
    %c0_21 = arith.constant 0 : index
    %c0_22 = arith.constant 0 : index
    %35 = vector.load %arg6[%c0_20, %c0_21, %c0_22] : memref<10x10x8xf32, #tpu.memory_space<vmem>>, vector<10x10x8xf32>
    tpu.vector_store %arg6[%c0_20, %c0_21, %c0_22], %34 {strides = array<i32>} : memref<10x10x8xf32, #tpu.memory_space<vmem>>, vector<10x10x8xf32>,
    %36 = vector.shape_cast %33 : vector<64x8xf32> to vector<8x8x8xf32>
    %c1_23 = arith.constant 1 : index
    %c1_24 = arith.constant 1 : index
    %c0_25 = arith.constant 0 : index
    %37 = vector.load %arg6[%c1_23, %c1_24, %c0_25] : memref<10x10x8xf32, #tpu.memory_space<vmem>>, vector<8x8x8xf32>
    tpu.vector_store %arg6[%c1_23, %c1_24, %c0_25], %36 {strides = array<i32>} : memref<10x10x8xf32, #tpu.memory_space<vmem>>, vector<8x8x8xf32>,
    %cst_26 = arith.constant 0.000000e+00 : f32
    %38 = vector.broadcast %cst_26 : f32 to vector<1x4xf32>
    %cst_27 = arith.constant 0.000000e+00 : f32
    %39 = vector.broadcast %cst_27 : f32 to vector<1x4xf32>
    %cst_28 = arith.constant 0.000000e+00 : f32
    %40 = vector.broadcast %cst_28 : f32 to vector<64x4xf32>
    %c0_29 = arith.constant 0 : index
    %c0_30 = arith.constant 0 : index
    %c0_31 = arith.constant 0 : index
    %41 = vector.load %arg6[%c0_29, %c0_30, %c0_31] : memref<10x10x8xf32, #tpu.memory_space<vmem>>, vector<8x8x8xf32>
    %42 = vector.shape_cast %41 : vector<8x8x8xf32> to vector<64x8xf32>
    %c0_32 = arith.constant 0 : index
    %c0_33 = arith.constant 0 : index
    %c0_34 = arith.constant 0 : index
    %43 = vector.load %arg3[%c0_32, %c0_33, %c0_34] : memref<16x8x4xf32, #tpu.memory_space<vmem>>, vector<1x8x4xf32>
    %44 = vector.shape_cast %43 : vector<1x8x4xf32> to vector<8x4xf32>
    %cst_35 = arith.constant dense<0.000000e+00> : vector<64x4xf32>
    %45 = tpu.matmul %42, %44, %cst_35 {dimension_numbers = #tpu.dot_dimension_numbers<[1], [0], [0], [1], [0, 0, 1, 1], [], []>} : vector<64x8xf32>, vector<8x4xf32>, vector<64x4xf32> -> vector<64x4xf32>
    %46 = arith.addf %40, %45 : vector<64x4xf32>
    %c0_36 = arith.constant 0 : index
    %c1_37 = arith.constant 1 : index
    %c0_38 = arith.constant 0 : index
    %47 = vector.load %arg6[%c0_36, %c1_37, %c0_38] : memref<10x10x8xf32, #tpu.memory_space<vmem>>, vector<8x8x8xf32>
    %48 = vector.shape_cast %47 : vector<8x8x8xf32> to vector<64x8xf32>
    %c1_39 = arith.constant 1 : index
    %c0_40 = arith.constant 0 : index
    %c0_41 = arith.constant 0 : index
    %49 = vector.load %arg3[%c1_39, %c0_40, %c0_41] : memref<16x8x4xf32, #tpu.memory_space<vmem>>, vector<1x8x4xf32>
    %50 = vector.shape_cast %49 : vector<1x8x4xf32> to vector<8x4xf32>
    %cst_42 = arith.constant dense<0.000000e+00> : vector<64x4xf32>
    %51 = tpu.matmul %48, %50, %cst_42 {dimension_numbers = #tpu.dot_dimension_numbers<[1], [0], [0], [1], [0, 0, 1, 1], [], []>} : vector<64x8xf32>, vector<8x4xf32>, vector<64x4xf32> -> vector<64x4xf32>
    %52 = arith.addf %46, %51 : vector<64x4xf32>
    %c1_43 = arith.constant 1 : index
    %c0_44 = arith.constant 0 : index
    %c0_45 = arith.constant 0 : index
    %53 = vector.load %arg6[%c1_43, %c0_44, %c0_45] : memref<10x10x8xf32, #tpu.memory_space<vmem>>, vector<8x8x8xf32>
    %54 = vector.shape_cast %53 : vector<8x8x8xf32> to vector<64x8xf32>
    %c2_46 = arith.constant 2 : index
    %c0_47 = arith.constant 0 : index
    %c0_48 = arith.constant 0 : index
    %55 = vector.load %arg3[%c2_46, %c0_47, %c0_48] : memref<16x8x4xf32, #tpu.memory_space<vmem>>, vector<1x8x4xf32>
    %56 = vector.shape_cast %55 : vector<1x8x4xf32> to vector<8x4xf32>
    %cst_49 = arith.constant dense<0.000000e+00> : vector<64x4xf32>
    %57 = tpu.matmul %54, %56, %cst_49 {dimension_numbers = #tpu.dot_dimension_numbers<[1], [0], [0], [1], [0, 0, 1, 1], [], []>} : vector<64x8xf32>, vector<8x4xf32>, vector<64x4xf32> -> vector<64x4xf32>
    %58 = arith.addf %52, %57 : vector<64x4xf32>
    %c1_50 = arith.constant 1 : index
    %c1_51 = arith.constant 1 : index
    %c0_52 = arith.constant 0 : index
    %59 = vector.load %arg6[%c1_50, %c1_51, %c0_52] : memref<10x10x8xf32, #tpu.memory_space<vmem>>, vector<8x8x8xf32>
    %60 = vector.shape_cast %59 : vector<8x8x8xf32> to vector<64x8xf32>
    %c3_53 = arith.constant 3 : index
    %c0_54 = arith.constant 0 : index
    %c0_55 = arith.constant 0 : index
    %61 = vector.load %arg3[%c3_53, %c0_54, %c0_55] : memref<16x8x4xf32, #tpu.memory_space<vmem>>, vector<1x8x4xf32>
    %62 = vector.shape_cast %61 : vector<1x8x4xf32> to vector<8x4xf32>
    %cst_56 = arith.constant dense<0.000000e+00> : vector<64x4xf32>
    %63 = tpu.matmul %60, %62, %cst_56 {dimension_numbers = #tpu.dot_dimension_numbers<[1], [0], [0], [1], [0, 0, 1, 1], [], []>} : vector<64x8xf32>, vector<8x4xf32>, vector<64x4xf32> -> vector<64x4xf32>
    %64 = arith.addf %58, %63 : vector<64x4xf32>
    %65 = tpu.transpose %64, [1, 0] : vector<64x4xf32> -> vector<4x64xf32>
    %c0_57 = arith.constant 0 : index
    %c0_58 = arith.constant 0 : index
    %c0_59 = arith.constant 0 : index
    %66 = vector.load %arg4[%c0_57, %c0_58, %c0_59] : memref<1x4x256xf32, #tpu.memory_space<vmem>>, vector<1x4x64xf32>
    %67 = vector.shape_cast %66 : vector<1x4x64xf32> to vector<4x64xf32>
    %68 = vector.shape_cast %65 : vector<4x64xf32> to vector<1x4x64xf32>
    tpu.vector_store %arg4[%c0_57, %c0_58, %c0_59], %68 {strides = array<i32>} : memref<1x4x256xf32, #tpu.memory_space<vmem>>, vector<1x4x64xf32>,
    %cst_60 = arith.constant dense<0.000000e+00> : vector<4xf32>
    %69 = vector.multi_reduction <add>, %64, %cst_60 [0] : vector<64x4xf32> to vector<4xf32>
    %70 = vector.shape_cast %69 : vector<4xf32> to vector<1x4xf32>
    %71 = arith.addf %38, %70 : vector<1x4xf32>
    %72 = arith.mulf %64, %64 : vector<64x4xf32>
    %cst_61 = arith.constant dense<0.000000e+00> : vector<4xf32>
    %73 = vector.multi_reduction <add>, %72, %cst_61 [0] : vector<64x4xf32> to vector<4xf32>
    %74 = vector.shape_cast %73 : vector<4xf32> to vector<1x4xf32>
    %75 = arith.addf %39, %74 : vector<1x4xf32>
    %cst_62 = arith.constant 0.000000e+00 : f32
    %76 = vector.broadcast %cst_62 : f32 to vector<64x4xf32>
    %c0_63 = arith.constant 0 : index
    %c1_64 = arith.constant 1 : index
    %c0_65 = arith.constant 0 : index
    %77 = vector.load %arg6[%c0_63, %c1_64, %c0_65] : memref<10x10x8xf32, #tpu.memory_space<vmem>>, vector<8x8x8xf32>
    %78 = vector.shape_cast %77 : vector<8x8x8xf32> to vector<64x8xf32>
    %c4 = arith.constant 4 : index
    %c0_66 = arith.constant 0 : index
    %c0_67 = arith.constant 0 : index
    %79 = vector.load %arg3[%c4, %c0_66, %c0_67] : memref<16x8x4xf32, #tpu.memory_space<vmem>>, vector<1x8x4xf32>
    %80 = vector.shape_cast %79 : vector<1x8x4xf32> to vector<8x4xf32>
    %cst_68 = arith.constant dense<0.000000e+00> : vector<64x4xf32>
    %81 = tpu.matmul %78, %80, %cst_68 {dimension_numbers = #tpu.dot_dimension_numbers<[1], [0], [0], [1], [0, 0, 1, 1], [], []>} : vector<64x8xf32>, vector<8x4xf32>, vector<64x4xf32> -> vector<64x4xf32>
    %82 = arith.addf %76, %81 : vector<64x4xf32>
    %c0_69 = arith.constant 0 : index
    %c2_70 = arith.constant 2 : index
    %c0_71 = arith.constant 0 : index
    %83 = vector.load %arg6[%c0_69, %c2_70, %c0_71] : memref<10x10x8xf32, #tpu.memory_space<vmem>>, vector<8x8x8xf32>
    %84 = vector.shape_cast %83 : vector<8x8x8xf32> to vector<64x8xf32>
    %c5 = arith.constant 5 : index
    %c0_72 = arith.constant 0 : index
    %c0_73 = arith.constant 0 : index
    %85 = vector.load %arg3[%c5, %c0_72, %c0_73] : memref<16x8x4xf32, #tpu.memory_space<vmem>>, vector<1x8x4xf32>
    %86 = vector.shape_cast %85 : vector<1x8x4xf32> to vector<8x4xf32>
    %cst_74 = arith.constant dense<0.000000e+00> : vector<64x4xf32>
    %87 = tpu.matmul %84, %86, %cst_74 {dimension_numbers = #tpu.dot_dimension_numbers<[1], [0], [0], [1], [0, 0, 1, 1], [], []>} : vector<64x8xf32>, vector<8x4xf32>, vector<64x4xf32> -> vector<64x4xf32>
    %88 = arith.addf %82, %87 : vector<64x4xf32>
    %c1_75 = arith.constant 1 : index
    %c1_76 = arith.constant 1 : index
    %c0_77 = arith.constant 0 : index
    %89 = vector.load %arg6[%c1_75, %c1_76, %c0_77] : memref<10x10x8xf32, #tpu.memory_space<vmem>>, vector<8x8x8xf32>
    %90 = vector.shape_cast %89 : vector<8x8x8xf32> to vector<64x8xf32>
    %c6 = arith.constant 6 : index
    %c0_78 = arith.constant 0 : index
    %c0_79 = arith.constant 0 : index
    %91 = vector.load %arg3[%c6, %c0_78, %c0_79] : memref<16x8x4xf32, #tpu.memory_space<vmem>>, vector<1x8x4xf32>
    %92 = vector.shape_cast %91 : vector<1x8x4xf32> to vector<8x4xf32>
    %cst_80 = arith.constant dense<0.000000e+00> : vector<64x4xf32>
    %93 = tpu.matmul %90, %92, %cst_80 {dimension_numbers = #tpu.dot_dimension_numbers<[1], [0], [0], [1], [0, 0, 1, 1], [], []>} : vector<64x8xf32>, vector<8x4xf32>, vector<64x4xf32> -> vector<64x4xf32>
    %94 = arith.addf %88, %93 : vector<64x4xf32>
    %c1_81 = arith.constant 1 : index
    %c2_82 = arith.constant 2 : index
    %c0_83 = arith.constant 0 : index
    %95 = vector.load %arg6[%c1_81, %c2_82, %c0_83] : memref<10x10x8xf32, #tpu.memory_space<vmem>>, vector<8x8x8xf32>
    %96 = vector.shape_cast %95 : vector<8x8x8xf32> to vector<64x8xf32>
    %c7 = arith.constant 7 : index
    %c0_84 = arith.constant 0 : index
    %c0_85 = arith.constant 0 : index
    %97 = vector.load %arg3[%c7, %c0_84, %c0_85] : memref<16x8x4xf32, #tpu.memory_space<vmem>>, vector<1x8x4xf32>
    %98 = vector.shape_cast %97 : vector<1x8x4xf32> to vector<8x4xf32>
    %cst_86 = arith.constant dense<0.000000e+00> : vector<64x4xf32>
    %99 = tpu.matmul %96, %98, %cst_86 {dimension_numbers = #tpu.dot_dimension_numbers<[1], [0], [0], [1], [0, 0, 1, 1], [], []>} : vector<64x8xf32>, vector<8x4xf32>, vector<64x4xf32> -> vector<64x4xf32>
    %100 = arith.addf %94, %99 : vector<64x4xf32>
    %101 = tpu.transpose %100, [1, 0] : vector<64x4xf32> -> vector<4x64xf32>
    %c0_87 = arith.constant 0 : index
    %c0_88 = arith.constant 0 : index
    %c64 = arith.constant 64 : index
    %102 = vector.load %arg4[%c0_87, %c0_88, %c64] : memref<1x4x256xf32, #tpu.memory_space<vmem>>, vector<1x4x64xf32>
    %103 = vector.shape_cast %102 : vector<1x4x64xf32> to vector<4x64xf32>
    %104 = vector.shape_cast %101 : vector<4x64xf32> to vector<1x4x64xf32>
    tpu.vector_store %arg4[%c0_87, %c0_88, %c64], %104 {strides = array<i32>} : memref<1x4x256xf32, #tpu.memory_space<vmem>>, vector<1x4x64xf32>,
    %cst_89 = arith.constant dense<0.000000e+00> : vector<4xf32>
    %105 = vector.multi_reduction <add>, %100, %cst_89 [0] : vector<64x4xf32> to vector<4xf32>
    %106 = vector.shape_cast %105 : vector<4xf32> to vector<1x4xf32>
    %107 = arith.addf %71, %106 : vector<1x4xf32>
    %108 = arith.mulf %100, %100 : vector<64x4xf32>
    %cst_90 = arith.constant dense<0.000000e+00> : vector<4xf32>
    %109 = vector.multi_reduction <add>, %108, %cst_90 [0] : vector<64x4xf32> to vector<4xf32>
    %110 = vector.shape_cast %109 : vector<4xf32> to vector<1x4xf32>
    %111 = arith.addf %75, %110 : vector<1x4xf32>
    %cst_91 = arith.constant 0.000000e+00 : f32
    %112 = vector.broadcast %cst_91 : f32 to vector<64x4xf32>
    %c1_92 = arith.constant 1 : index
    %c0_93 = arith.constant 0 : index
    %c0_94 = arith.constant 0 : index
    %113 = vector.load %arg6[%c1_92, %c0_93, %c0_94] : memref<10x10x8xf32, #tpu.memory_space<vmem>>, vector<8x8x8xf32>
    %114 = vector.shape_cast %113 : vector<8x8x8xf32> to vector<64x8xf32>
    %c8 = arith.constant 8 : index
    %c0_95 = arith.constant 0 : index
    %c0_96 = arith.constant 0 : index
    %115 = vector.load %arg3[%c8, %c0_95, %c0_96] : memref<16x8x4xf32, #tpu.memory_space<vmem>>, vector<1x8x4xf32>
    %116 = vector.shape_cast %115 : vector<1x8x4xf32> to vector<8x4xf32>
    %cst_97 = arith.constant dense<0.000000e+00> : vector<64x4xf32>
    %117 = tpu.matmul %114, %116, %cst_97 {dimension_numbers = #tpu.dot_dimension_numbers<[1], [0], [0], [1], [0, 0, 1, 1], [], []>} : vector<64x8xf32>, vector<8x4xf32>, vector<64x4xf32> -> vector<64x4xf32>
    %118 = arith.addf %112, %117 : vector<64x4xf32>
    %c1_98 = arith.constant 1 : index
    %c1_99 = arith.constant 1 : index
    %c0_100 = arith.constant 0 : index
    %119 = vector.load %arg6[%c1_98, %c1_99, %c0_100] : memref<10x10x8xf32, #tpu.memory_space<vmem>>, vector<8x8x8xf32>
    %120 = vector.shape_cast %119 : vector<8x8x8xf32> to vector<64x8xf32>
    %c9 = arith.constant 9 : index
    %c0_101 = arith.constant 0 : index
    %c0_102 = arith.constant 0 : index
    %121 = vector.load %arg3[%c9, %c0_101, %c0_102] : memref<16x8x4xf32, #tpu.memory_space<vmem>>, vector<1x8x4xf32>
    %122 = vector.shape_cast %121 : vector<1x8x4xf32> to vector<8x4xf32>
    %cst_103 = arith.constant dense<0.000000e+00> : vector<64x4xf32>
    %123 = tpu.matmul %120, %122, %cst_103 {dimension_numbers = #tpu.dot_dimension_numbers<[1], [0], [0], [1], [0, 0, 1, 1], [], []>} : vector<64x8xf32>, vector<8x4xf32>, vector<64x4xf32> -> vector<64x4xf32>
    %124 = arith.addf %118, %123 : vector<64x4xf32>
    %c2_104 = arith.constant 2 : index
    %c0_105 = arith.constant 0 : index
    %c0_106 = arith.constant 0 : index
    %125 = vector.load %arg6[%c2_104, %c0_105, %c0_106] : memref<10x10x8xf32, #tpu.memory_space<vmem>>, vector<8x8x8xf32>
    %126 = vector.shape_cast %125 : vector<8x8x8xf32> to vector<64x8xf32>
    %c10 = arith.constant 10 : index
    %c0_107 = arith.constant 0 : index
    %c0_108 = arith.constant 0 : index
    %127 = vector.load %arg3[%c10, %c0_107, %c0_108] : memref<16x8x4xf32, #tpu.memory_space<vmem>>, vector<1x8x4xf32>
    %128 = vector.shape_cast %127 : vector<1x8x4xf32> to vector<8x4xf32>
    %cst_109 = arith.constant dense<0.000000e+00> : vector<64x4xf32>
    %129 = tpu.matmul %126, %128, %cst_109 {dimension_numbers = #tpu.dot_dimension_numbers<[1], [0], [0], [1], [0, 0, 1, 1], [], []>} : vector<64x8xf32>, vector<8x4xf32>, vector<64x4xf32> -> vector<64x4xf32>
    %130 = arith.addf %124, %129 : vector<64x4xf32>
    %c2_110 = arith.constant 2 : index
    %c1_111 = arith.constant 1 : index
    %c0_112 = arith.constant 0 : index
    %131 = vector.load %arg6[%c2_110, %c1_111, %c0_112] : memref<10x10x8xf32, #tpu.memory_space<vmem>>, vector<8x8x8xf32>
    %132 = vector.shape_cast %131 : vector<8x8x8xf32> to vector<64x8xf32>
    %c11 = arith.constant 11 : index
    %c0_113 = arith.constant 0 : index
    %c0_114 = arith.constant 0 : index
    %133 = vector.load %arg3[%c11, %c0_113, %c0_114] : memref<16x8x4xf32, #tpu.memory_space<vmem>>, vector<1x8x4xf32>
    %134 = vector.shape_cast %133 : vector<1x8x4xf32> to vector<8x4xf32>
    %cst_115 = arith.constant dense<0.000000e+00> : vector<64x4xf32>
    %135 = tpu.matmul %132, %134, %cst_115 {dimension_numbers = #tpu.dot_dimension_numbers<[1], [0], [0], [1], [0, 0, 1, 1], [], []>} : vector<64x8xf32>, vector<8x4xf32>, vector<64x4xf32> -> vector<64x4xf32>
    %136 = arith.addf %130, %135 : vector<64x4xf32>
    %137 = tpu.transpose %136, [1, 0] : vector<64x4xf32> -> vector<4x64xf32>
    %c0_116 = arith.constant 0 : index
    %c0_117 = arith.constant 0 : index
    %c128 = arith.constant 128 : index
    %138 = vector.load %arg4[%c0_116, %c0_117, %c128] : memref<1x4x256xf32, #tpu.memory_space<vmem>>, vector<1x4x64xf32>
    %139 = vector.shape_cast %138 : vector<1x4x64xf32> to vector<4x64xf32>
    %140 = vector.shape_cast %137 : vector<4x64xf32> to vector<1x4x64xf32>
    tpu.vector_store %arg4[%c0_116, %c0_117, %c128], %140 {strides = array<i32>} : memref<1x4x256xf32, #tpu.memory_space<vmem>>, vector<1x4x64xf32>,
    %cst_118 = arith.constant dense<0.000000e+00> : vector<4xf32>
    %141 = vector.multi_reduction <add>, %136, %cst_118 [0] : vector<64x4xf32> to vector<4xf32>
    %142 = vector.shape_cast %141 : vector<4xf32> to vector<1x4xf32>
    %143 = arith.addf %107, %142 : vector<1x4xf32>
    %144 = arith.mulf %136, %136 : vector<64x4xf32>
    %cst_119 = arith.constant dense<0.000000e+00> : vector<4xf32>
    %145 = vector.multi_reduction <add>, %144, %cst_119 [0] : vector<64x4xf32> to vector<4xf32>
    %146 = vector.shape_cast %145 : vector<4xf32> to vector<1x4xf32>
    %147 = arith.addf %111, %146 : vector<1x4xf32>
    %cst_120 = arith.constant 0.000000e+00 : f32
    %148 = vector.broadcast %cst_120 : f32 to vector<64x4xf32>
    %c1_121 = arith.constant 1 : index
    %c1_122 = arith.constant 1 : index
    %c0_123 = arith.constant 0 : index
    %149 = vector.load %arg6[%c1_121, %c1_122, %c0_123] : memref<10x10x8xf32, #tpu.memory_space<vmem>>, vector<8x8x8xf32>
    %150 = vector.shape_cast %149 : vector<8x8x8xf32> to vector<64x8xf32>
    %c12 = arith.constant 12 : index
    %c0_124 = arith.constant 0 : index
    %c0_125 = arith.constant 0 : index
    %151 = vector.load %arg3[%c12, %c0_124, %c0_125] : memref<16x8x4xf32, #tpu.memory_space<vmem>>, vector<1x8x4xf32>
    %152 = vector.shape_cast %151 : vector<1x8x4xf32> to vector<8x4xf32>
    %cst_126 = arith.constant dense<0.000000e+00> : vector<64x4xf32>
    %153 = tpu.matmul %150, %152, %cst_126 {dimension_numbers = #tpu.dot_dimension_numbers<[1], [0], [0], [1], [0, 0, 1, 1], [], []>} : vector<64x8xf32>, vector<8x4xf32>, vector<64x4xf32> -> vector<64x4xf32>
    %154 = arith.addf %148, %153 : vector<64x4xf32>
    %c1_127 = arith.constant 1 : index
    %c2_128 = arith.constant 2 : index
    %c0_129 = arith.constant 0 : index
    %155 = vector.load %arg6[%c1_127, %c2_128, %c0_129] : memref<10x10x8xf32, #tpu.memory_space<vmem>>, vector<8x8x8xf32>
    %156 = vector.shape_cast %155 : vector<8x8x8xf32> to vector<64x8xf32>
    %c13 = arith.constant 13 : index
    %c0_130 = arith.constant 0 : index
    %c0_131 = arith.constant 0 : index
    %157 = vector.load %arg3[%c13, %c0_130, %c0_131] : memref<16x8x4xf32, #tpu.memory_space<vmem>>, vector<1x8x4xf32>
    %158 = vector.shape_cast %157 : vector<1x8x4xf32> to vector<8x4xf32>
    %cst_132 = arith.constant dense<0.000000e+00> : vector<64x4xf32>
    %159 = tpu.matmul %156, %158, %cst_132 {dimension_numbers = #tpu.dot_dimension_numbers<[1], [0], [0], [1], [0, 0, 1, 1], [], []>} : vector<64x8xf32>, vector<8x4xf32>, vector<64x4xf32> -> vector<64x4xf32>
    %160 = arith.addf %154, %159 : vector<64x4xf32>
    %c2_133 = arith.constant 2 : index
    %c1_134 = arith.constant 1 : index
    %c0_135 = arith.constant 0 : index
    %161 = vector.load %arg6[%c2_133, %c1_134, %c0_135] : memref<10x10x8xf32, #tpu.memory_space<vmem>>, vector<8x8x8xf32>
    %162 = vector.shape_cast %161 : vector<8x8x8xf32> to vector<64x8xf32>
    %c14 = arith.constant 14 : index
    %c0_136 = arith.constant 0 : index
    %c0_137 = arith.constant 0 : index
    %163 = vector.load %arg3[%c14, %c0_136, %c0_137] : memref<16x8x4xf32, #tpu.memory_space<vmem>>, vector<1x8x4xf32>
    %164 = vector.shape_cast %163 : vector<1x8x4xf32> to vector<8x4xf32>
    %cst_138 = arith.constant dense<0.000000e+00> : vector<64x4xf32>
    %165 = tpu.matmul %162, %164, %cst_138 {dimension_numbers = #tpu.dot_dimension_numbers<[1], [0], [0], [1], [0, 0, 1, 1], [], []>} : vector<64x8xf32>, vector<8x4xf32>, vector<64x4xf32> -> vector<64x4xf32>
    %166 = arith.addf %160, %165 : vector<64x4xf32>
    %c2_139 = arith.constant 2 : index
    %c2_140 = arith.constant 2 : index
    %c0_141 = arith.constant 0 : index
    %167 = vector.load %arg6[%c2_139, %c2_140, %c0_141] : memref<10x10x8xf32, #tpu.memory_space<vmem>>, vector<8x8x8xf32>
    %168 = vector.shape_cast %167 : vector<8x8x8xf32> to vector<64x8xf32>
    %c15 = arith.constant 15 : index
    %c0_142 = arith.constant 0 : index
    %c0_143 = arith.constant 0 : index
    %169 = vector.load %arg3[%c15, %c0_142, %c0_143] : memref<16x8x4xf32, #tpu.memory_space<vmem>>, vector<1x8x4xf32>
    %170 = vector.shape_cast %169 : vector<1x8x4xf32> to vector<8x4xf32>
    %cst_144 = arith.constant dense<0.000000e+00> : vector<64x4xf32>
    %171 = tpu.matmul %168, %170, %cst_144 {dimension_numbers = #tpu.dot_dimension_numbers<[1], [0], [0], [1], [0, 0, 1, 1], [], []>} : vector<64x8xf32>, vector<8x4xf32>, vector<64x4xf32> -> vector<64x4xf32>
    %172 = arith.addf %166, %171 : vector<64x4xf32>
    %173 = tpu.transpose %172, [1, 0] : vector<64x4xf32> -> vector<4x64xf32>
    %c0_145 = arith.constant 0 : index
    %c0_146 = arith.constant 0 : index
    %c192 = arith.constant 192 : index
    %174 = vector.load %arg4[%c0_145, %c0_146, %c192] : memref<1x4x256xf32, #tpu.memory_space<vmem>>, vector<1x4x64xf32>
    %175 = vector.shape_cast %174 : vector<1x4x64xf32> to vector<4x64xf32>
    %176 = vector.shape_cast %173 : vector<4x64xf32> to vector<1x4x64xf32>
    tpu.vector_store %arg4[%c0_145, %c0_146, %c192], %176 {strides = array<i32>} : memref<1x4x256xf32, #tpu.memory_space<vmem>>, vector<1x4x64xf32>,
    %cst_147 = arith.constant dense<0.000000e+00> : vector<4xf32>
    %177 = vector.multi_reduction <add>, %172, %cst_147 [0] : vector<64x4xf32> to vector<4xf32>
    %178 = vector.shape_cast %177 : vector<4xf32> to vector<1x4xf32>
    %179 = arith.addf %143, %178 : vector<1x4xf32>
    %180 = arith.mulf %172, %172 : vector<64x4xf32>
    %cst_148 = arith.constant dense<0.000000e+00> : vector<4xf32>
    %181 = vector.multi_reduction <add>, %180, %cst_148 [0] : vector<64x4xf32> to vector<4xf32>
    %182 = vector.shape_cast %181 : vector<4xf32> to vector<1x4xf32>
    %183 = arith.addf %147, %182 : vector<1x4xf32>
    %184 = tpu.concatenate %179, %183 in 0 : vector<1x4xf32>, vector<1x4xf32> -> vector<2x4xf32>
    %c0_149 = arith.constant 0 : index
    %c0_150 = arith.constant 0 : index
    %c0_151 = arith.constant 0 : index
    %185 = vector.load %arg5[%c0_149, %c0_150, %c0_151] : memref<1x2x4xf32, #tpu.memory_space<vmem>>, vector<1x2x4xf32>
    %186 = vector.shape_cast %185 : vector<1x2x4xf32> to vector<2x4xf32>
    %187 = vector.shape_cast %184 : vector<2x4xf32> to vector<1x2x4xf32>
    tpu.vector_store %arg5[%c0_149, %c0_150, %c0_151], %187 {strides = array<i32>} : memref<1x2x4xf32, #tpu.memory_space<vmem>>, vector<1x2x4xf32>,
    return
  }
  func.func @transform_0(%arg0: i32) -> (i32, i32, i32, i32) {
    %c0_i32 = arith.constant 0 : i32
    %c0_i32_0 = arith.constant 0 : i32
    %c0_i32_1 = arith.constant 0 : i32
    %c0_i32_2 = arith.constant 0 : i32
    return %arg0, %c0_i32, %c0_i32_0, %c0_i32_1 : i32, i32, i32, i32
  }
  func.func @transform_1(%arg0: i32) -> (i32, i32, i32) {
    %c0_i32 = arith.constant 0 : i32
    %c0_i32_0 = arith.constant 0 : i32
    %c0_i32_1 = arith.constant 0 : i32
    %c0_i32_2 = arith.constant 0 : i32
    return %c0_i32, %c0_i32_0, %c0_i32_1 : i32, i32, i32
  }
  func.func @transform_2(%arg0: i32) -> (i32, i32, i32) {
    %c0_i32 = arith.constant 0 : i32
    %c0_i32_0 = arith.constant 0 : i32
    %c0_i32_1 = arith.constant 0 : i32
    %c0_i32_2 = arith.constant 0 : i32
    return %c0_i32, %c0_i32_0, %c0_i32_1 : i32, i32, i32
  }
  func.func @transform_3(%arg0: i32) -> (i32, i32, i32) {
    %c0_i32 = arith.constant 0 : i32
    %c0_i32_0 = arith.constant 0 : i32
    %c0_i32_1 = arith.constant 0 : i32
    return %arg0, %c0_i32, %c0_i32_0 : i32, i32, i32
  }
  func.func @transform_4(%arg0: i32) -> (i32, i32, i32) {
    %c0_i32 = arith.constant 0 : i32
    %c0_i32_0 = arith.constant 0 : i32
    %c0_i32_1 = arith.constant 0 : i32
    return %arg0, %c0_i32, %c0_i32_0 : i32, i32, i32
  }
}

</mosaic_0001>

<bundles_post_ra>
// kernel: tpu_custom_call.1
= control target key start
LH: loop header
LB: loop body
LE: loop exit
PB: predicated region body
PF: predicated region fallthrough
CT: control target
= control target key end

     0   :  { %10 = vsyncpa [#allocation4], 0  ;;  %s5357_s0 = inlined_call_operand.vmem [shape: f32[2,9,9,16], index: 0, kind: input, shape index: {}]   ;;  %s5358_s1 = inlined_call_operand.vmem [shape: f32[4,16,8], index: 1, kind: input, shape index: {}]   ;;  %s5359_s2 = inlined_call_operand.vmem [shape: f32[16,8,4], index: 2, kind: input, shape index: {}]   ;;  %s5360_s3 = inlined_call_operand.hbm [shape: f32[2,4,256], index: 3, kind: output, shape index: {0}]   ;;  %s5361_s4 = inlined_call_operand.hbm [shape: f32[2,2,4], index: 4, kind: output, shape index: {1}]  }
   0x1   :  { %12 = vsyncpa [#allocation4 + $0x1], 0 }
   0x2   :  { %13 = vsyncpa [#allocation6], 0 }
   0x3   :  { %15 = vsyncpa [#allocation6 + $0x1], 0  ;;  %s4591_s15 = smov 0   ;;  %s4593_s16 = smov 0  }
   0x4   :  { %s4595_s17 = smov 0   ;;  %s4597_s18 = smov 0  }
   0x5 LB: > { %s4612_s19 = sadd.s32 4294967295, %s4560_s18   ;;  %s3615_s20 = sadd.s32 4294967294, %s4560_s18   ;;  %s4560_s18 = sphi %s4597_s18, %s5367_s18   ;;  %s4556_s17 = sphi %s4595_s17, %s5366_s17   ;;  %s4552_s16 = sphi %s4593_s16, %s5365_s16   ;;  %s4548_s15 = sphi %s4591_s15, %s5364_s15  }
   0x6   : > { %s4616_s21 = sadd.s32 1, %s4560_s18   ;;  %s96_s22 = sadd.s32 1, %s4556_s17 }
   0x7   : > { %s93_s23 = ssub.s32 %s4560_s18, %s4616_s21  ;;  %p106_p0 = scmp.ne.s32.totalorder %s4556_s17, %s4552_s16 }
   0x8   : > { %p94_p1 = scmp.eq.s32.totalorder %s93_s23, 0  ;;  %p107_p2 = scmp.eq.s32.totalorder %s4612_s19, 1 }
   0x9   : > { %p112_p3 = scmp.ne.s32.totalorder %s4552_s16, %s4548_s15  ;;  %p113_p4 = scmp.eq.s32.totalorder %s3615_s20, 1 }
   0xa   : > { %s4627_s24 = scalar_select %p94_p1, %s4556_s17, %s96_s22  }
   0xb   : > { %p4629_p5 = por %p107_p2, %p106_p0  ;;  %p4633_p6 = por %p113_p4, %p112_p3 }
   0xc   : > { %p3618_p7 = scmp.ge.s32.totalorder %s4560_s18, 1  ;;  %p171_p8 = scmp.lt.s32.totalorder %s4560_s18, 3 }
   0xe   : > { %p172_p9 = pnand %p3618_p7, %p171_p8 }
   0xf   : > { %v3622_v0 = vld [vmem:[%s5358_s1 + $0x10] sm:$0xff] (!%p172_p9)  ;;  %v3623_v1 = vld [vmem:[%s5358_s1 + $0x18] sm:$0xff] (!%p172_p9)  ;;  %p202_p10 = scmp.lt.s32.totalorder (!%p172_p9), %s4612_s19, 1  ;;  %v279_v2 = vld [vmem:[%s5358_s1] sm:$0xff] (!%p172_p9)  ;;  %vm297_vm0 = vcmask (!%p172_p9), 1046528   ;;  %vm325_vm1 = vcmask (!%p172_p9), 130048  }
  0x10   : > { %175 = sbr.rel (%p172_p9) target bundleno = 926 (0x39e), region = 32  ;;  %v4283_v3 = vpack.c.bf16 (!%p172_p9), %v3623_v1, %v3622_v0  ;;  %v280_v4 = vld [vmem:[%s5358_s1 + $0x8] sm:$0xff] (!%p172_p9)  ;;  %v3640_v6 = vld [vmem:[%s5358_s1 + $0x20] sm:$0xff] (!%p172_p9)  ;;  %s5245_s29 = sand.u32 (!%p172_p9), 1, %s4552_s16  }
  0x11   : > { %v4287_v5 = vpack.c.bf16 (!%p172_p9), %v280_v4, %v279_v2  ;;  %v3641_v7 = vld [vmem:[%s5358_s1 + $0x28] sm:$0xff] (!%p172_p9)  ;;  %s3619_s30 = sshll.u32 (!%p172_p9), %s5245_s29, 3  ;;  %s3620_s6 = sshll.u32 (!%p172_p9), %s5245_s29, 1 }
  0x12   : > { %4284 = vmatprep.subr.bf16.mxu0 (!%p172_p9), %v4283_v3  ;;  %v4669_v16 = vpack.c.bf16 (!%p172_p9), %v3641_v7, %v3640_v6  ;;  %s5252_s5 = scalar_lea.vmem (!%p172_p9), [#allocation3], %s3619_s30  ;;  %s201_s7 = scalar_lea.vmem (!%p172_p9), [#allocation5], %s3620_s6 }
  0x13   : > { %4286 = vmatpush3.bf16.msra.mxu0 (!%p172_p9), %v4283_v3  ;;  %s4563_s8 = smov (!%p172_p9), 64   ;;  %s3497_s14 = scalar_lea.sflag (!%p172_p9), [#allocation6], %s5245_s29 }
  0x14   : > { %4288 = vmatprep.subr.bf16.mxu0 (!%p172_p9), %v4287_v5  ;;  %s4564_s22 = smov (!%p172_p9), [#allocation5]  }
  0x15   : > { %s4470_s23 = sshll.u32 (!%p172_p9), %s4564_s22, 4  ;;  %s4471_s23 = int_to_ptr.vmem [resolvable:$false] %s4470_s23 }
  0x16   : > { %s4472_s27 = scalar_lea.vmem (!%p172_p9), %s4471_s23, 64 }
  0x17   : > { %s203_s9 = scalar_select %p202_p10, %s4612_s19, 1 }
  0x19   : > { %s4419_s10 = smul.u32 144, %s203_s9  ;;  %s3807_s9 = sshll.u32 %s4612_s19, 5 }
  0x1b   : > { %s4656_s13 = scalar_lea.vmem %s5357_s0, %s4419_s10  ;;  %s3524_s10 = sshll.u32 %s201_s7, 4  ;;  %s3525_s10 = int_to_ptr.vmem [resolvable:$true] %s3524_s10 }
  0x1c   : > { %v207_v8 = vld [vmem:[%s4656_s13] sm:$0xff]  ;;  %v208_v9 = vld [vmem:[%s4656_s13 + $0x8] sm:$0x1]  ;;  %v209_v10 = vld [vmem:[%s4656_s13 + $0x10] sm:$0xff]  ;;  %s4466_s20 = scalar_lea.vmem %s3525_s10, 32  ;;  %p4473_p0 = scmp.lt.s32.totalorder %s3525_s10, %s4471_s23 }
  0x1d   : > { %vm225_vm2 = vcmp.gt.f32.partialorder %v207_v8, 0.0  ;;  %vm226_vm3 = vcmp.gt.f32.partialorder %v208_v9, 0.0  ;;  %v243_v11 = vmul.f32 0.2, %v207_v8  ;;  %v244_v12 = vmul.f32 0.2, %v208_v9  ;;  %p4467_p11 = scmp.ne.s32.totalorder %s3525_s10, %s4466_s20  ;;  %p4474_p1 = scmp.lt.s32.totalorder %s4472_s27, %s4466_s20 }
  0x1e   : > { %v210_v13 = vld [vmem:[%s4656_s13 + $0x18] sm:$0x1]  ;;  %vm227_vm4 = vcmp.gt.f32.partialorder %v209_v10, 0.0  ;;  %v245_v14 = vmul.f32 0.2, %v209_v10  ;;  %v211_v15 = vld [vmem:[%s4656_s13 + $0x20] sm:$0xff] }
  0x1f   : > { %v4671_v17 = vsel %vm225_vm2, %v207_v8, %v243_v11  ;;  %v262_v18 = vsel %vm226_vm3, %v208_v9, %v244_v12  ;;  %vm228_vm5 = vcmp.gt.f32.partialorder %v210_v13, 0.0  ;;  %v246_v19 = vmul.f32 0.2, %v210_v13  ;;  %v212_v20 = vld [vmem:[%s4656_s13 + $0x28] sm:$0x1]  ;;  %v213_v21 = vld [vmem:[%s4656_s13 + $0x30] sm:$0xff]  ;;  %p4468_p12 = pnand %p4467_p11, %p4629_p5  ;;  %p4475_p2 = por %p4474_p1, %p4473_p0 }
  0x20   : > { %v298_v22 = vrot.slane %v4671_v17, 1  ;;  %v299_v23 = vrot.slane %v262_v18, 1  ;;  %v4676_v24 = vsel %vm227_vm4, %v209_v10, %v245_v14  ;;  %vm229_vm6 = vcmp.gt.f32.partialorder %v211_v15, 0.0  ;;  %v214_v25 = vld [vmem:[%s4656_s13 + $0x38] sm:$0x1]  ;;  %v215_v29 = vld [vmem:[%s4656_s13 + $0x40] sm:$0xff] }
  0x21   : > { %v264_v26 = vsel %vm228_vm5, %v210_v13, %v246_v19  ;;  %v301_v27 = vrot.slane %v4676_v24, 1  ;;  %vm230_vm7 = vcmp.gt.f32.partialorder %v212_v20, 0.0  ;;  %v247_v28 = vmul.f32 0.2, %v211_v15  ;;  %v216_v33 = vld [vmem:[%s4656_s13 + $0x48] sm:$0x1]  ;;  %p4469_p13 = pneg %p4468_p12 }
  0x22   : > { %v300_v30 = vsel %vm297_vm0, %v298_v22, %v299_v23  ;;  %v302_v31 = vrot.slane %v264_v26, 1  ;;  %v248_v32 = vmul.f32 0.2, %v212_v20  ;;  %vm231_vm8 = vcmp.gt.f32.partialorder %v213_v21, 0.0  ;;  %v217_v40 = vld [vmem:[%s4656_s13 + $0x50] sm:$0xff]  ;;  %v219_v45 = vld [vmem:[%s4656_s13 + $0x60] sm:$0xff] }
  0x23   : > { %3999 = vmatprep.mubr.msk.f32.mxu0 %vm325_vm1, %v300_v30  ;;  %v4684_v34 = vsel %vm229_vm6, %v211_v15, %v247_v28  ;;  %vm232_vm9 = vcmp.gt.f32.partialorder %v214_v25, 0.0  ;;  %v249_v35 = vmul.f32 0.2, %v213_v21  ;;  %v250_v36 = vmul.f32 0.2, %v214_v25  ;;  %v221_v57 = vld [vmem:[%s4656_s13 + $0x70] sm:$0xff]  ;;  %p4476_p3 = pnand %p4475_p2, %p4469_p13 }
  0x24   : > { %v4687_v37 = vsel %vm297_vm0, %v301_v27, %v302_v31  ;;  %v266_v38 = vsel %vm230_vm7, %v212_v20, %v248_v32  ;;  %v304_v39 = vrot.slane %v4684_v34, 1  ;;  %vm233_vm10 = vcmp.gt.f32.partialorder %v215_v29, 0.0  ;;  %v218_v41 = vld [vmem:[%s4656_s13 + $0x58] sm:$0x1]  ;;  %v220_v52 = vld [vmem:[%s4656_s13 + $0x68] sm:$0x1] }
  0x25   : > { %4000 = vmatmul.mubr.msk.f32.vlgmr.msra.gmra.mrb[0].mxu0 %vm325_vm1, %v4687_v37  ;;  %v305_v42 = vrot.slane %v266_v38, 1  ;;  %v4694_v43 = vsel %vm231_vm8, %v213_v21, %v249_v35  ;;  %v268_v44 = vsel %vm232_vm9, %v214_v25, %v250_v36  ;;  %vm234_vm11 = vcmp.gt.f32.partialorder %v216_v33, 0.0  ;;  %v222_v61 = vld [vmem:[%s4656_s13 + $0x78] sm:$0x1]  ;;  %v3650_v19 = vld [vmem:[%s5358_s1 + $0x30] sm:$0xff]  ;;  %v3660_v30 = vld [vmem:[%s5359_s2 + $0x8] sm:$0xff] }
  0x26   : > { %4290 = vmatpush3.bf16.msra.mxu0 %v4287_v5  ;;  %v307_v46 = vrot.slane %v4694_v43, 1  ;;  %v308_v47 = vrot.slane %v268_v44, 1  ;;  %v251_v48 = vmul.f32 0.2, %v215_v29  ;;  %v252_v49 = vmul.f32 0.2, %v216_v33 }
  0x27   : > { %v4699_v50 = vsel %vm297_vm0, %v304_v39, %v305_v42  ;;  %vm235_vm12 = vcmp.gt.f32.partialorder %v217_v40, 0.0  ;;  %vm236_vm13 = vcmp.gt.f32.partialorder %v218_v41, 0.0  ;;  %v253_v51 = vmul.f32 0.2, %v217_v40  ;;  %4292 = vmatprep.subr.bf16.mxu0 %v4669_v16  ;;  %v3651_v20 = vld [vmem:[%s5358_s1 + $0x38] sm:$0xff]  ;;  %v3677_v31 = vld [vmem:[%s5359_s2 + $0x10] sm:$0xff] }
  0x28   : > { %4002 = vmatprep.mubr.msk.f32.mxu0 %vm325_vm1, %v4699_v50  ;;  %v4706_v53 = vsel %vm297_vm0, %v307_v46, %v308_v47  ;;  %v269_v54 = vsel %vm233_vm10, %v215_v29, %v251_v48  ;;  %v270_v55 = vsel %vm234_vm11, %v216_v33, %v252_v49  ;;  %v254_v56 = vmul.f32 0.2, %v218_v41  ;;  %v224_v23 = vld [vmem:[%s4656_s13 + $0x88] sm:$0x1]  ;;  %4087 = vmatprep.subr.mxu1 %v3677_v31  ;;  %v3686_v33 = vld [vmem:[%s5359_s2 + $0x18] sm:$0xff] }
  0x29   : > { %4003 = vmatmul.mubr.msk.f32.gmra.mrb[2].mxu0 %vm325_vm1, %v4706_v53  ;;  %v310_v58 = vrot.slane %v269_v54, 1  ;;  %v311_v59 = vrot.slane %v270_v55, 1  ;;  %v271_v60 = vsel %vm235_vm12, %v217_v40, %v253_v51  ;;  %vm237_vm14 = vcmp.gt.f32.partialorder %v219_v45, 0.0  ;;  %4088 = vmatpush3.msra.mxu1 %v3677_v31  ;;  %v3696_v49 = vld [vmem:[%s5359_s2 + $0x28] sm:$0xff] }
  0x2a   : > { %v272_v62 = vsel %vm236_vm13, %v218_v41, %v254_v56  ;;  %v313_v63 = vrot.slane %v271_v60, 1  ;;  %vm238_vm15 = vcmp.gt.f32.partialorder %v220_v52, 0.0  ;;  %v255_v0 = vmul.f32 0.2, %v219_v45  ;;  %4101 = vmatprep.subr.mxu1 %v3686_v33 }
  0x2b   : > { %v312_v1 = vsel %vm297_vm0, %v310_v58, %v311_v59  ;;  %v314_v2 = vrot.slane %v272_v62, 1  ;;  %v256_v3 = vmul.f32 0.2, %v220_v52  ;;  %vm239_vm2 = vcmp.gt.f32.partialorder %v221_v57, 0.0 }
  0x2c   : > { %4005 = vmatprep.mubr.msk.f32.mxu0 %vm325_vm1, %v312_v1  ;;  %v273_v4 = vsel %vm237_vm14, %v219_v45, %v255_v0  ;;  %vm240_vm3 = vcmp.gt.f32.partialorder %v222_v61, 0.0  ;;  %v257_v5 = vmul.f32 0.2, %v221_v57  ;;  %v258_v6 = vmul.f32 0.2, %v222_v61 }
  0x2d   : > { %v315_v7 = vsel %vm297_vm0, %v313_v63, %v314_v2  ;;  %v274_v8 = vsel %vm238_vm15, %v220_v52, %v256_v3  ;;  %v316_v9 = vrot.slane %v273_v4, 1  ;;  %v4295_v21 = vpack.c.bf16 %v3651_v20, %v3650_v19  ;;  %v3722_v20 = vld [vmem:[%s5359_s2 + $0x38] sm:$0xff] }
  0x2e   : > { %4006 = vmatmul.mubr.msk.f32.gmra.mrb[4].mxu0 %vm325_vm1, %v315_v7  ;;  %v317_v10 = vrot.slane %v274_v8, 1  ;;  %v275_v11 = vsel %vm239_vm2, %v221_v57, %v257_v5  ;;  %v276_v12 = vsel %vm240_vm3, %v222_v61, %v258_v6  ;;  %vm242_vm5 = vcmp.gt.f32.partialorder %v224_v23, 0.0  ;;  %v3695_v5 = vld [vmem:[%s5359_s2 + $0x20] sm:$0xff] }
  0x2f   : > { %v319_v13 = vrot.slane %v275_v11, 1  ;;  %v320_v14 = vrot.slane %v276_v12, 1  ;;  %vm817_vm6 = vcmask 64512   ;;  %vm819_vm7 = vcmask 58368   ;;  %v3731_v6 = vld [vmem:[%s5359_s2 + $0x40] sm:$0xff]  ;;  %v3749_v12 = vld [vmem:[%s5359_s2 + $0x50] sm:$0xff] }
  0x30   : > { %v318_v15 = vsel %vm297_vm0, %v316_v9, %v317_v10  ;;  %v4562_v29 = vmov 0.0   ;;  %v3713_v10 = vld [vmem:[%s5359_s2 + $0x30] sm:$0xff]  ;;  %vm3487_vm8 = vcmask 1040384   ;;  %vm3489_vm9 = vcmask 25600  }
  0x31   : > { %4008 = vmatprep.mubr.msk.f32.mxu0 %vm325_vm1, %v318_v15  ;;  %v321_v18 = vsel %vm297_vm0, %v319_v13, %v320_v14  ;;  %823 = vst.msk [vmem:[#allocation2 + $0x20] sm:$0xff] %vm817_vm6, %v4562_v29  ;;  %818 = vst.msk [vmem:[#allocation2] sm:$0xff] %vm817_vm6, %v4562_v29 }
  0x32   : > { %4009 = vmatmul.mubr.msk.f32.gmra.mrb[6].mxu0 %vm325_vm1, %v321_v18  ;;  %824 = vst.msk [vmem:[#allocation2 + $0x28] sm:$0x3] %vm819_vm7, %v4562_v29  ;;  %820 = vst.msk [vmem:[#allocation2 + $0x8] sm:$0x3] %vm819_vm7, %v4562_v29 }
  0x33   : > { %4015 = vmatprep.mubr.msk.f32.mxu0 %vm325_vm1, %v4671_v17  ;;  %821 = vst.msk [vmem:[#allocation2 + $0x10] sm:$0xff] %vm817_vm6, %v4562_v29  ;;  %825 = vst.msk [vmem:[#allocation2 + $0x30] sm:$0xff] %vm817_vm6, %v4562_v29 }
  0x34   : > { %822 = vst.msk [vmem:[#allocation2 + $0x18] sm:$0x3] %vm819_vm7, %v4562_v29  ;;  %826 = vst.msk [vmem:[#allocation2 + $0x38] sm:$0x3] %vm819_vm7, %v4562_v29 }
  0x35   : > { %827 = vst.msk [vmem:[#allocation2 + $0x40] sm:$0xff] %vm817_vm6, %v4562_v29  ;;  %829 = vst.msk [vmem:[#allocation2 + $0x50] sm:$0xff] %vm817_vm6, %v4562_v29 }
  0x36   : > { %4016 = vmatmul.mubr.msk.f32.vlgmr.msra.gmra.mrb[0].mxu0 %vm325_vm1, %v4676_v24  ;;  %828 = vst.msk [vmem:[#allocation2 + $0x48] sm:$0x3] %vm819_vm7, %v4562_v29  ;;  %830 = vst.msk [vmem:[#allocation2 + $0x58] sm:$0x3] %vm819_vm7, %v4562_v29 }
  0x37   : > { %4294 = vmatpush3.bf16.msra.mxu0 %v4669_v16  ;;  %4018 = vmatprep.mubr.msk.f32.mxu0 %vm325_vm1, %v4684_v34  ;;  %v223_v16 = vld [vmem:[%s4656_s13 + $0x80] sm:$0xff]  ;;  %831 = vst.msk [vmem:[#allocation2 + $0x60] sm:$0xff] %vm817_vm6, %v4562_v29  ;;  %833 = vst.msk [vmem:[#allocation2 + $0x70] sm:$0xff] %vm817_vm6, %v4562_v29  ;;  %s5284_s13 = scalar_lea.hbm %s5361_s4, %s3807_s9 }
  0x38   : > { %4296 = vmatprep.subr.bf16.mxu0 %v4295_v21  ;;  %v259_v17 = vmul.f32 0.2, %v223_v16  ;;  %vm241_vm4 = vcmp.gt.f32.partialorder %v223_v16, 0.0  ;;  %832 = vst.msk [vmem:[#allocation2 + $0x68] sm:$0x3] %vm819_vm7, %v4562_v29 }
  0x39   : > { %834 = vst.msk [vmem:[#allocation2 + $0x78] sm:$0x3] %vm819_vm7, %v4562_v29  ;;  %836 = vst.msk [vmem:[#allocation2 + $0x88] sm:$0x3] %vm819_vm7, %v4562_v29  ;;  %v4793_v32 = vld [vmem:[#allocation2 + $0x1] sm:$0xff] }
  0x3a   : > { %4019 = vmatmul.mubr.msk.f32.gmra.mrb[2].mxu0 %vm325_vm1, %v4694_v43  ;;  %v277_v22 = vsel %vm241_vm4, %v223_v16, %v259_v17  ;;  %835 = vst.msk [vmem:[#allocation2 + $0x80] sm:$0xff] %vm817_vm6, %v4562_v29  ;;  %837 = vst.msk [vmem:[#allocation2 + $0x90] sm:$0xff] %vm817_vm6, %v4562_v29  ;;  %v3768_v16 = vld [vmem:[%s5359_s2 + $0x68] sm:$0xff] }
  0x3b   : > { %4021 = vmatprep.mubr.msk.f32.mxu0 %vm325_vm1, %v269_v54  ;;  %v688_v26 = vrot.slane %v277_v22, 1  ;;  %838 = vst.msk [vmem:[#allocation2 + $0x98] sm:$0x3] %vm819_vm7, %v4562_v29 }
  0x3e   : > { %4022 = vmatmul.mubr.msk.f32.gmra.mrb[4].mxu0 %vm325_vm1, %v271_v60 }
  0x3f   : > { %4024 = vmatprep.mubr.msk.f32.mxu0 %vm325_vm1, %v273_v4 }
  0x41   : > { %v2454_v17 = vld [vmem:[#allocation2 + $0x90] sm:$0xff] }
  0x42   : > { %4025 = vmatmul.mubr.msk.f32.gmra.mrb[6].mxu0 %vm325_vm1, %v275_v11 }
  0x43   : > { %4031 = vmatprep.mubr.msk.f32.mxu0 %vm325_vm1, %v4676_v24  ;;  %v260_v24 = vmul.f32 0.2, %v224_v23 }
  0x45   : > { %v278_v25 = vsel %vm242_vm5, %v224_v23, %v260_v24  ;;  %v2601_v23 = vld [vmem:[#allocation2 + $0x91] sm:$0xff] }
  0x46   : > { %4032 = vmatmul.mubr.msk.f32.vlgmr.msra.gmra.mrb[0].mxu0 %vm325_vm1, %v4684_v34  ;;  %v689_v27 = vrot.slane %v278_v25, 1  ;;  %v856_v34 = vld [vmem:[%s5359_s2] sm:$0xff]  ;;  %v3785_v25 = vld [vmem:[%s5359_s2 + $0x70] sm:$0xff] }
  0x47   : > { %4298 = vmatpush3.bf16.msra.mxu0 %v4295_v21  ;;  %4034 = vmatprep.mubr.msk.f32.mxu0 %vm325_vm1, %v4694_v43  ;;  %v3758_v21 = vld [vmem:[%s5359_s2 + $0x58] sm:$0xff] }
  0x48   : > { %v690_v28 = vsel %vm297_vm0, %v688_v26, %v689_v27  ;;  %4059 = vmatprep.subr.mxu0 %v3660_v30  ;;  %v3794_v26 = vld [vmem:[%s5359_s2 + $0x78] sm:$0xff]  ;;  %vm1453_vm0 = vcmask 31744  }
  0x49   : > { %v3258_v27 = vld [vmem:[#allocation2 + $0x92] sm:$0xff] }
  0x4a   : > { %4035 = vmatmul.mubr.msk.f32.gmra.mrb[2].mxu0 %vm325_vm1, %v269_v54 }
  0x4b   : > { %4037 = vmatprep.mubr.msk.f32.mxu0 %vm325_vm1, %v271_v60 }
  0x4e   : > { %4038 = vmatmul.mubr.msk.f32.gmra.mrb[4].mxu0 %vm325_vm1, %v273_v4 }
  0x4f   : > { %4040 = vmatprep.mubr.msk.f32.mxu0 %vm325_vm1, %v275_v11 }
  0x52   : > { %4041 = vmatmul.mubr.msk.f32.gmra.mrb[6].mxu0 %vm325_vm1, %v277_v22  ;;  %v3767_v22 = vld [vmem:[%s5359_s2 + $0x60] sm:$0xff] }
  0x53   : > { %4047 = vmatprep.mubr.msk.f32.mxu0 %vm325_vm1, %v4687_v37 }
  0x56   : > { %4048 = vmatmul.mubr.msk.f32.vlgmr.msra.gmra.mrb[0].mxu0 %vm325_vm1, %v4699_v50 }
  0x57   : > { %4050 = vmatprep.mubr.msk.f32.mxu0 %vm325_vm1, %v4706_v53  ;;  %4060 = vmatpush3.msra.mxu0 %v3660_v30  ;;  %v3732_v53 = vld [vmem:[%s5359_s2 + $0x48] sm:$0xff] }
  0x58   : > { %4073 = vmatprep.subr.mxu0 %v856_v34 }
  0x5a   : > { %4051 = vmatmul.mubr.msk.f32.gmra.mrb[2].mxu0 %vm325_vm1, %v312_v1  ;;  %v848_v1 = vld [vmem:[#allocation2] sm:$0xff] }
  0x5b   : > { %4053 = vmatprep.mubr.msk.f32.mxu0 %vm325_vm1, %v315_v7  ;;  %v1516_v7 = vld [vmem:[#allocation2 + $0x2] sm:$0xff] }
  0x5e   : > { %4054 = vmatmul.mubr.msk.f32.gmra.mrb[4].mxu0 %vm325_vm1, %v318_v15 }
  0x5f   : > { %4056 = vmatprep.mubr.msk.f32.mxu0 %vm325_vm1, %v321_v18 }
  0x62   : > { %4057 = vmatmul.mubr.msk.f32.gmra.mrb[6].mxu0 %vm325_vm1, %v690_v28  ;;  %vm1451_vm1 = vcmask 519168  }
  0x63   : > { %4061 = vmatprep.mubr.msk.f32.mxu0 %vm817_vm6, %v4793_v32 }
 0x129   : > { %v4049_v35 = vpop.f32.mrb[0].mxu0 }
 0x12a   : > { %v810_v36 = vmax.f32 %v4049_v35, 0.0  ;;  %v762_v37 = vpop.f32.mrb[1].mxu0 }
 0x12b   : > { %v809_v38 = vmax.f32 %v762_v37, 0.0 }
 0x12c   : > { %841 = vst.msk [vmem:[#allocation2 + $0x21] sm:$0xff] %vm817_vm6, %v810_v36 }
 0x12d   : > { %840 = vst.msk [vmem:[#allocation2 + $0x11] sm:$0xff] %vm817_vm6, %v809_v38  ;;  %v4052_v39 = vpop.f32.mrb[2].mxu0 }
 0x12e   : > { %v812_v40 = vmax.f32 %v4052_v39, 0.0  ;;  %v772_v41 = vpop.f32.mrb[3].mxu0 }
 0x12f   : > { %v811_v42 = vmax.f32 %v772_v41, 0.0 }
 0x130   : > { %843 = vst.msk [vmem:[#allocation2 + $0x41] sm:$0xff] %vm817_vm6, %v812_v40 }
 0x131   : > { %842 = vst.msk [vmem:[#allocation2 + $0x31] sm:$0xff] %vm817_vm6, %v811_v42  ;;  %v4055_v43 = vpop.f32.mrb[4].mxu0 }
 0x132   : > { %v814_v44 = vmax.f32 %v4055_v43, 0.0  ;;  %v782_v45 = vpop.f32.mrb[5].mxu0 }
 0x133   : > { %v813_v46 = vmax.f32 %v782_v45, 0.0  ;;  %v4820_v51 = vld [vmem:[#allocation2 + $0x21] sm:$0xff] }
 0x134   : > { %845 = vst.msk [vmem:[#allocation2 + $0x61] sm:$0xff] %vm817_vm6, %v814_v44  ;;  %v4808_v47 = vld [vmem:[#allocation2 + $0x11] sm:$0xff]  ;;  %v4822_v52 = vld [vmem:[#allocation2 + $0x20] sm:$0xff] }
 0x135   : > { %v4810_v48 = vld [vmem:[#allocation2 + $0x10] sm:$0xff]  ;;  %844 = vst.msk [vmem:[#allocation2 + $0x51] sm:$0xff] %vm817_vm6, %v813_v46  ;;  %v4058_v50 = vpop.f32.mrb[6].mxu0  ;;  %4062 = vmatmul.mubr.msk.f32.vlgmr.msra.gmra.mrb[8].mxu0 %vm817_vm6, %v4808_v47  ;;  %v4930_v11 = vld [vmem:[#allocation2 + $0x22] sm:$0xff] }
 0x136   : > { %4089 = vmatprep.mubr.msk.f32.mxu1 %vm817_vm6, %v4810_v48  ;;  %v816_v54 = vmax.f32 %v4058_v50, 0.0  ;;  %v792_v55 = vpop.f32.mrb[7].mxu0  ;;  %4064 = vmatprep.mubr.msk.f32.mxu0 %vm817_vm6, %v4820_v51  ;;  %v4921_v9 = vld [vmem:[#allocation2 + $0x12] sm:$0xff] }
 0x137   : > { %4090 = vmatmul.mubr.msk.f32.vlgmr.msra.gmra.mrb[0].mxu1 %vm817_vm6, %v4822_v52  ;;  %v815_v56 = vmax.f32 %v792_v55, 0.0  ;;  %4074 = vmatpush3.msra.mxu0 %v856_v34  ;;  %v4841_v59 = vld [vmem:[#allocation2 + $0x41] sm:$0xff] }
 0x138   : > { %4102 = vmatpush3.msra.mxu1 %v3686_v33  ;;  %847 = vst.msk [vmem:[#allocation2 + $0x81] sm:$0xff] %vm817_vm6, %v816_v54  ;;  %v4832_v57 = vld [vmem:[#allocation2 + $0x31] sm:$0xff]  ;;  %4171 = vmatprep.subr.mxu0 %v3732_v53  ;;  %v4843_v60 = vld [vmem:[#allocation2 + $0x40] sm:$0xff] }
 0x139   : > { %v4834_v58 = vld [vmem:[#allocation2 + $0x30] sm:$0xff]  ;;  %4115 = vmatprep.subr.mxu1 %v3696_v49  ;;  %846 = vst.msk [vmem:[#allocation2 + $0x71] sm:$0xff] %vm817_vm6, %v815_v56  ;;  %4065 = vmatmul.mubr.msk.f32.gmra.mrb[10].mxu0 %vm817_vm6, %v4832_v57  ;;  %v4945_v14 = vld [vmem:[#allocation2 + $0x42] sm:$0xff] }
 0x13a   : > { %4092 = vmatprep.mubr.msk.f32.mxu1 %vm817_vm6, %v4834_v58  ;;  %4067 = vmatprep.mubr.msk.f32.mxu0 %vm817_vm6, %v4841_v59  ;;  %v4939_v13 = vld [vmem:[#allocation2 + $0x32] sm:$0xff] }
 0x13b   : > { %4093 = vmatmul.mubr.msk.f32.gmra.mrb[2].mxu1 %vm817_vm6, %v4843_v60  ;;  %v4857_v63 = vld [vmem:[#allocation2 + $0x61] sm:$0xff] }
 0x13c   : > { %v4849_v61 = vld [vmem:[#allocation2 + $0x51] sm:$0xff]  ;;  %v4859_v0 = vld [vmem:[#allocation2 + $0x60] sm:$0xff] }
 0x13d   : > { %v4851_v62 = vld [vmem:[#allocation2 + $0x50] sm:$0xff]  ;;  %4068 = vmatmul.mubr.msk.f32.gmra.mrb[12].mxu0 %vm817_vm6, %v4849_v61  ;;  %v4957_v18 = vld [vmem:[#allocation2 + $0x62] sm:$0xff] }
 0x13e   : > { %4095 = vmatprep.mubr.msk.f32.mxu1 %vm817_vm6, %v4851_v62  ;;  %4070 = vmatprep.mubr.msk.f32.mxu0 %vm817_vm6, %v4857_v63  ;;  %v4951_v15 = vld [vmem:[#allocation2 + $0x52] sm:$0xff] }
 0x13f   : > { %4096 = vmatmul.mubr.msk.f32.gmra.mrb[4].mxu1 %vm817_vm6, %v4859_v0  ;;  %v4873_v4 = vld [vmem:[#allocation2 + $0x80] sm:$0xff] }
 0x140   : > { %v4865_v2 = vld [vmem:[#allocation2 + $0x71] sm:$0xff]  ;;  %v4912_v8 = vld [vmem:[#allocation2 + $0x81] sm:$0xff] }
 0x141   : > { %v4867_v3 = vld [vmem:[#allocation2 + $0x70] sm:$0xff]  ;;  %4071 = vmatmul.mubr.msk.f32.gmra.mrb[14].mxu0 %vm817_vm6, %v4865_v2  ;;  %v1938_v24 = vld [vmem:[#allocation2 + $0x82] sm:$0xff] }
 0x142   : > { %4098 = vmatprep.mubr.msk.f32.mxu1 %vm817_vm6, %v4867_v3  ;;  %4075 = vmatprep.mubr.msk.f32.mxu0 %vm817_vm6, %v848_v1  ;;  %v4963_v19 = vld [vmem:[#allocation2 + $0x72] sm:$0xff] }
 0x143   : > { %4099 = vmatmul.mubr.msk.f32.gmra.mrb[6].mxu1 %vm817_vm6, %v4873_v4 }
 0x144   : > { %4103 = vmatprep.mubr.msk.f32.mxu1 %vm817_vm6, %v4808_v47 }
 0x145   : > { %4076 = vmatmul.mubr.msk.f32.vlgmr.msra.gmra.mrb[8].mxu0 %vm817_vm6, %v4810_v48 }
 0x146   : > { %4078 = vmatprep.mubr.msk.f32.mxu0 %vm817_vm6, %v4822_v52  ;;  %4172 = vmatpush3.msra.mxu0 %v3732_v53 }
 0x147   : > { %4104 = vmatmul.mubr.msk.f32.vlgmr.msra.gmra.mrb[0].mxu1 %vm817_vm6, %v4820_v51  ;;  %4185 = vmatprep.subr.mxu0 %v3731_v6 }
 0x148   : > { %4116 = vmatpush3.msra.mxu1 %v3696_v49  ;;  %4106 = vmatprep.mubr.msk.f32.mxu1 %vm817_vm6, %v4832_v57 }
 0x149   : > { %4129 = vmatprep.subr.mxu1 %v3695_v5  ;;  %4079 = vmatmul.mubr.msk.f32.gmra.mrb[10].mxu0 %vm817_vm6, %v4834_v58 }
 0x14a   : > { %4081 = vmatprep.mubr.msk.f32.mxu0 %vm817_vm6, %v4843_v60 }
 0x14b   : > { %4107 = vmatmul.mubr.msk.f32.gmra.mrb[2].mxu1 %vm817_vm6, %v4841_v59 }
 0x14c   : > { %4109 = vmatprep.mubr.msk.f32.mxu1 %vm817_vm6, %v4849_v61 }
 0x14d   : > { %4082 = vmatmul.mubr.msk.f32.gmra.mrb[12].mxu0 %vm817_vm6, %v4851_v62 }
 0x14e   : > { %4084 = vmatprep.mubr.msk.f32.mxu0 %vm817_vm6, %v4859_v0 }
 0x14f   : > { %4110 = vmatmul.mubr.msk.f32.gmra.mrb[4].mxu1 %vm817_vm6, %v4857_v63 }
 0x150   : > { %4112 = vmatprep.mubr.msk.f32.mxu1 %vm817_vm6, %v4865_v2 }
 0x151   : > { %4085 = vmatmul.mubr.msk.f32.gmra.mrb[14].mxu0 %vm817_vm6, %v4867_v3 }
 0x152   : > { %4173 = vmatprep.mubr.msk.f32.mxu0 %vm817_vm6, %v4808_v47 }
 0x153   : > { %4113 = vmatmul.mubr.msk.f32.gmra.mrb[6].mxu1 %vm817_vm6, %v4912_v8 }
 0x154   : > { %4117 = vmatprep.mubr.msk.f32.mxu1 %vm817_vm6, %v1516_v7 }
 0x155   : > { %4174 = vmatmul.mubr.msk.f32.vlgmr.msra.gmra.mrb[16].mxu0 %vm817_vm6, %v4820_v51 }
 0x156   : > { %4176 = vmatprep.mubr.msk.f32.mxu0 %vm817_vm6, %v4832_v57  ;;  %4186 = vmatpush3.msra.mxu0 %v3731_v6 }
 0x157   : > { %4118 = vmatmul.mubr.msk.f32.vlgmr.msra.gmra.mrb[8].mxu1 %vm817_vm6, %v4921_v9  ;;  %4199 = vmatprep.subr.mxu0 %v3749_v12 }
 0x158   : > { %4130 = vmatpush3.msra.mxu1 %v3695_v5  ;;  %4120 = vmatprep.mubr.msk.f32.mxu1 %vm817_vm6, %v4930_v11 }
 0x159   : > { %4143 = vmatprep.subr.mxu1 %v3713_v10  ;;  %4177 = vmatmul.mubr.msk.f32.gmra.mrb[18].mxu0 %vm817_vm6, %v4841_v59 }
 0x15a   : > { %4179 = vmatprep.mubr.msk.f32.mxu0 %vm817_vm6, %v4849_v61 }
 0x15b   : > { %4121 = vmatmul.mubr.msk.f32.gmra.mrb[10].mxu1 %vm817_vm6, %v4939_v13 }
 0x15c   : > { %4123 = vmatprep.mubr.msk.f32.mxu1 %vm817_vm6, %v4945_v14 }
 0x15d   : > { %4180 = vmatmul.mubr.msk.f32.gmra.mrb[20].mxu0 %vm817_vm6, %v4857_v63 }
 0x15e   : > { %4182 = vmatprep.mubr.msk.f32.mxu0 %vm817_vm6, %v4865_v2 }
 0x15f   : > { %4124 = vmatmul.mubr.msk.f32.gmra.mrb[12].mxu1 %vm817_vm6, %v4951_v15 }
 0x160   : > { %4126 = vmatprep.mubr.msk.f32.mxu1 %vm817_vm6, %v4957_v18 }
 0x161   : > { %4183 = vmatmul.mubr.msk.f32.gmra.mrb[22].mxu0 %vm817_vm6, %v4912_v8 }
 0x162   : > { %4187 = vmatprep.mubr.msk.f32.mxu0 %vm817_vm6, %v4810_v48 }
 0x163   : > { %4127 = vmatmul.mubr.msk.f32.gmra.mrb[14].mxu1 %vm817_vm6, %v4963_v19 }
 0x164   : > { %4131 = vmatprep.mubr.msk.f32.mxu1 %vm817_vm6, %v4793_v32 }
 0x165   : > { %4188 = vmatmul.mubr.msk.f32.vlgmr.msra.gmra.mrb[16].mxu0 %vm817_vm6, %v4822_v52 }
 0x166   : > { %4190 = vmatprep.mubr.msk.f32.mxu0 %vm817_vm6, %v4834_v58  ;;  %4200 = vmatpush3.msra.mxu0 %v3749_v12 }
 0x167   : > { %4132 = vmatmul.mubr.msk.f32.vlgmr.msra.gmra.mrb[8].mxu1 %vm817_vm6, %v4808_v47  ;;  %4213 = vmatprep.subr.mxu0 %v3758_v21 }
 0x168   : > { %4144 = vmatpush3.msra.mxu1 %v3713_v10  ;;  %4134 = vmatprep.mubr.msk.f32.mxu1 %vm817_vm6, %v4820_v51 }
 0x169   : > { %4157 = vmatprep.subr.mxu1 %v3722_v20  ;;  %4191 = vmatmul.mubr.msk.f32.gmra.mrb[18].mxu0 %vm817_vm6, %v4843_v60 }
 0x16a   : > { %4193 = vmatprep.mubr.msk.f32.mxu0 %vm817_vm6, %v4851_v62 }
 0x16b   : > { %4135 = vmatmul.mubr.msk.f32.gmra.mrb[10].mxu1 %vm817_vm6, %v4832_v57 }
 0x16c   : > { %4137 = vmatprep.mubr.msk.f32.mxu1 %vm817_vm6, %v4841_v59 }
 0x16d   : > { %4194 = vmatmul.mubr.msk.f32.gmra.mrb[20].mxu0 %vm817_vm6, %v4859_v0 }
 0x16e   : > { %4196 = vmatprep.mubr.msk.f32.mxu0 %vm817_vm6, %v4867_v3 }
 0x16f   : > { %4138 = vmatmul.mubr.msk.f32.gmra.mrb[12].mxu1 %vm817_vm6, %v4849_v61 }
 0x170   : > { %4140 = vmatprep.mubr.msk.f32.mxu1 %vm817_vm6, %v4857_v63 }
 0x171   : > { %4197 = vmatmul.mubr.msk.f32.gmra.mrb[22].mxu0 %vm817_vm6, %v4873_v4 }
 0x172   : > { %4201 = vmatprep.mubr.msk.f32.mxu0 %vm817_vm6, %v4822_v52 }
 0x173   : > { %4141 = vmatmul.mubr.msk.f32.gmra.mrb[14].mxu1 %vm817_vm6, %v4865_v2 }
 0x174   : > { %4145 = vmatprep.mubr.msk.f32.mxu1 %vm817_vm6, %v4808_v47 }
 0x175   : > { %4202 = vmatmul.mubr.msk.f32.vlgmr.msra.gmra.mrb[16].mxu0 %vm817_vm6, %v4834_v58 }
 0x176   : > { %4204 = vmatprep.mubr.msk.f32.mxu0 %vm817_vm6, %v4843_v60  ;;  %4214 = vmatpush3.msra.mxu0 %v3758_v21 }
 0x177   : > { %4146 = vmatmul.mubr.msk.f32.vlgmr.msra.gmra.mrb[8].mxu1 %vm817_vm6, %v4820_v51 }
 0x178   : > { %4158 = vmatpush3.msra.mxu1 %v3722_v20  ;;  %4148 = vmatprep.mubr.msk.f32.mxu1 %vm817_vm6, %v4832_v57 }
 0x179   : > { %4227 = vmatprep.subr.mxu1 %v3768_v16  ;;  %4205 = vmatmul.mubr.msk.f32.gmra.mrb[18].mxu0 %vm817_vm6, %v4851_v62 }
 0x17a   : > { %4207 = vmatprep.mubr.msk.f32.mxu0 %vm817_vm6, %v4859_v0 }
 0x17b   : > { %4149 = vmatmul.mubr.msk.f32.gmra.mrb[10].mxu1 %vm817_vm6, %v4841_v59 }
 0x17c   : > { %4151 = vmatprep.mubr.msk.f32.mxu1 %vm817_vm6, %v4849_v61 }
 0x17d   : > { %4208 = vmatmul.mubr.msk.f32.gmra.mrb[20].mxu0 %vm817_vm6, %v4867_v3 }
 0x17e   : > { %4210 = vmatprep.mubr.msk.f32.mxu0 %vm817_vm6, %v4873_v4 }
 0x17f   : > { %4152 = vmatmul.mubr.msk.f32.gmra.mrb[12].mxu1 %vm817_vm6, %v4857_v63 }
 0x180   : > { %4154 = vmatprep.mubr.msk.f32.mxu1 %vm817_vm6, %v4865_v2 }
 0x181   : > { %4211 = vmatmul.mubr.msk.f32.gmra.mrb[22].mxu0 %vm817_vm6, %v2454_v17 }
 0x182   : > { %4215 = vmatprep.mubr.msk.f32.mxu0 %vm817_vm6, %v4820_v51 }
 0x183   : > { %4155 = vmatmul.mubr.msk.f32.gmra.mrb[14].mxu1 %vm817_vm6, %v4912_v8 }
 0x184   : > { %4159 = vmatprep.mubr.msk.f32.mxu1 %vm817_vm6, %v4921_v9 }
 0x185   : > { %4216 = vmatmul.mubr.msk.f32.vlgmr.msra.gmra.mrb[16].mxu0 %vm817_vm6, %v4832_v57 }
 0x186   : > { %4218 = vmatprep.mubr.msk.f32.mxu0 %vm817_vm6, %v4841_v59 }
 0x187   : > { %4160 = vmatmul.mubr.msk.f32.vlgmr.msra.gmra.mrb[8].mxu1 %vm817_vm6, %v4930_v11 }
 0x188   : > { %4228 = vmatpush3.msra.mxu1 %v3768_v16  ;;  %4162 = vmatprep.mubr.msk.f32.mxu1 %vm817_vm6, %v4939_v13 }
 0x189   : > { %4241 = vmatprep.subr.mxu1 %v3767_v22  ;;  %4219 = vmatmul.mubr.msk.f32.gmra.mrb[18].mxu0 %vm817_vm6, %v4849_v61 }
 0x18a   : > { %4221 = vmatprep.mubr.msk.f32.mxu0 %vm817_vm6, %v4857_v63 }
 0x18b   : > { %4163 = vmatmul.mubr.msk.f32.gmra.mrb[10].mxu1 %vm817_vm6, %v4945_v14 }
 0x18c   : > { %4165 = vmatprep.mubr.msk.f32.mxu1 %vm817_vm6, %v4951_v15 }
 0x18d   : > { %4222 = vmatmul.mubr.msk.f32.gmra.mrb[20].mxu0 %vm817_vm6, %v4865_v2 }
 0x18e   : > { %4224 = vmatprep.mubr.msk.f32.mxu0 %vm817_vm6, %v4912_v8 }
 0x18f   : > { %4166 = vmatmul.mubr.msk.f32.gmra.mrb[12].mxu1 %vm817_vm6, %v4957_v18 }
 0x190   : > { %4168 = vmatprep.mubr.msk.f32.mxu1 %vm817_vm6, %v4963_v19 }
 0x191   : > { %4225 = vmatmul.mubr.msk.f32.gmra.mrb[22].mxu0 %vm817_vm6, %v2601_v23 }
 0x193   : > { %4169 = vmatmul.mubr.msk.f32.gmra.mrb[14].mxu1 %vm817_vm6, %v1938_v24 }
 0x194   : > { %4229 = vmatprep.mubr.msk.f32.mxu1 %vm817_vm6, %v4921_v9 }
 0x197   : > { %4230 = vmatmul.mubr.msk.f32.vlgmr.msra.gmra.mrb[16].mxu1 %vm817_vm6, %v4930_v11 }
 0x198   : > { %4242 = vmatpush3.msra.mxu1 %v3767_v22  ;;  %4232 = vmatprep.mubr.msk.f32.mxu1 %vm817_vm6, %v4939_v13 }
 0x199   : > { %4255 = vmatprep.subr.mxu1 %v3785_v25 }
 0x19b   : > { %4233 = vmatmul.mubr.msk.f32.gmra.mrb[18].mxu1 %vm817_vm6, %v4945_v14 }
 0x19c   : > { %4235 = vmatprep.mubr.msk.f32.mxu1 %vm817_vm6, %v4951_v15 }
 0x19f   : > { %4236 = vmatmul.mubr.msk.f32.gmra.mrb[20].mxu1 %vm817_vm6, %v4957_v18 }
 0x1a0   : > { %4238 = vmatprep.mubr.msk.f32.mxu1 %vm817_vm6, %v4963_v19 }
 0x1a3   : > { %4239 = vmatmul.mubr.msk.f32.gmra.mrb[22].mxu1 %vm817_vm6, %v1938_v24 }
 0x1a4   : > { %4243 = vmatprep.mubr.msk.f32.mxu1 %vm817_vm6, %v4808_v47 }
 0x1a7   : > { %4244 = vmatmul.mubr.msk.f32.vlgmr.msra.gmra.mrb[16].mxu1 %vm817_vm6, %v4820_v51 }
 0x1a8   : > { %4256 = vmatpush3.msra.mxu1 %v3785_v25  ;;  %4246 = vmatprep.mubr.msk.f32.mxu1 %vm817_vm6, %v4832_v57 }
 0x1a9   : > { %4269 = vmatprep.subr.mxu1 %v3794_v26 }
 0x1ab   : > { %4247 = vmatmul.mubr.msk.f32.gmra.mrb[18].mxu1 %vm817_vm6, %v4841_v59 }
 0x1ac   : > { %4249 = vmatprep.mubr.msk.f32.mxu1 %vm817_vm6, %v4849_v61 }
 0x1af   : > { %4250 = vmatmul.mubr.msk.f32.gmra.mrb[20].mxu1 %vm817_vm6, %v4857_v63 }
 0x1b0   : > { %4252 = vmatprep.mubr.msk.f32.mxu1 %vm817_vm6, %v4865_v2 }
 0x1b3   : > { %4253 = vmatmul.mubr.msk.f32.gmra.mrb[22].mxu1 %vm817_vm6, %v4912_v8 }
 0x1b4   : > { %4257 = vmatprep.mubr.msk.f32.mxu1 %vm817_vm6, %v4820_v51 }
 0x1b7   : > { %4258 = vmatmul.mubr.msk.f32.vlgmr.msra.gmra.mrb[16].mxu1 %vm817_vm6, %v4832_v57 }
 0x1b8   : > { %4270 = vmatpush3.msra.mxu1 %v3794_v26  ;;  %4260 = vmatprep.mubr.msk.f32.mxu1 %vm817_vm6, %v4841_v59 }
 0x1bb   : > { %4261 = vmatmul.mubr.msk.f32.gmra.mrb[18].mxu1 %vm817_vm6, %v4849_v61 }
 0x1bc   : > { %4263 = vmatprep.mubr.msk.f32.mxu1 %vm817_vm6, %v4857_v63 }
 0x1bf   : > { %4264 = vmatmul.mubr.msk.f32.gmra.mrb[20].mxu1 %vm817_vm6, %v4865_v2 }
 0x1c0   : > { %4266 = vmatprep.mubr.msk.f32.mxu1 %vm817_vm6, %v4912_v8 }
 0x1c3   : > { %4267 = vmatmul.mubr.msk.f32.gmra.mrb[22].mxu1 %vm817_vm6, %v2601_v23 }
 0x1c4   : > { %4271 = vmatprep.mubr.msk.f32.mxu1 %vm817_vm6, %v4930_v11 }
 0x1c7   : > { %4272 = vmatmul.mubr.msk.f32.vlgmr.msra.gmra.mrb[16].mxu1 %vm817_vm6, %v4939_v13 }
 0x1c8   : > { %4274 = vmatprep.mubr.msk.f32.mxu1 %vm817_vm6, %v4945_v14 }
 0x1cb   : > { %4275 = vmatmul.mubr.msk.f32.gmra.mrb[18].mxu1 %vm817_vm6, %v4951_v15 }
 0x1cc   : > { %4277 = vmatprep.mubr.msk.f32.mxu1 %vm817_vm6, %v4957_v18 }
 0x1cf   : > { %4278 = vmatmul.mubr.msk.f32.gmra.mrb[20].mxu1 %vm817_vm6, %v4963_v19 }
 0x1d0   : > { %4280 = vmatprep.mubr.msk.f32.mxu1 %vm817_vm6, %v1938_v24 }
 0x1d3   : > { %4281 = vmatmul.mubr.msk.f32.gmra.mrb[22].mxu1 %vm817_vm6, %v3258_v27 }
 0x218   : > { %v4077_v28 = vpop.f32.mrb[8].mxu0 }
 0x219   : > { %v1086_v29 = vpop.f32.mrb[9].mxu0 }
 0x21a   : > { %v4105_v30 = vpop.f32.mrb[0].mxu1 }
 0x21b   : > { %v4299_v31 = vadd.f32 %v4105_v30, %v4077_v28  ;;  %v1372_v32 = vpop.f32.mrb[1].mxu1 }
 0x21c   : > { %v4300_v33 = vadd.f32 %v1372_v32, %v1086_v29  ;;  %v4080_v36 = vpop.f32.mrb[10].mxu0 }
 0x21d   : > { %v1455_v34 = vsel %vm1453_vm0, %v4299_v31, 0.0  ;;  %v1477_v35 = vmul.f32 %v4299_v31, %v4299_v31  ;;  %v1096_v40 = vpop.f32.mrb[11].mxu0 }
 0x21e   : > { %v1454_v37 = vsel %vm1453_vm0, %v4300_v33, 0.0  ;;  %v1476_v38 = vmul.f32 %v4300_v33, %v4300_v33  ;;  %v4108_v39 = vpop.f32.mrb[2].mxu1  ;;  %1419 = vxpose.xlu0.b32.start [1/8] (short) (narrow) %v4300_v33, 8 }
 0x21f   : > { %v1485_v41 = vsel %vm1453_vm0, %v1477_v35, 0.0  ;;  %v1456_v42 = vadd.f32 %v1455_v34, %v1454_v37  ;;  %v4301_v43 = vadd.f32 %v4108_v39, %v4080_v36  ;;  %v1382_v44 = vpop.f32.mrb[3].mxu1 }
 0x220   : > { %v1484_v45 = vsel %vm1453_vm0, %v1476_v38, 0.0  ;;  %v4302_v46 = vadd.f32 %v1382_v44, %v1096_v40  ;;  %v4083_v48 = vpop.f32.mrb[12].mxu0 }
 0x221   : > { %v1486_v47 = vadd.f32 %v1485_v41, %v1484_v45  ;;  %v1479_v49 = vmul.f32 %v4301_v43, %v4301_v43  ;;  %v1106_v53 = vpop.f32.mrb[13].mxu0  ;;  %v1459_v57 = vsel %vm1453_vm0, %v4301_v43, 0.0 }
 0x222   : > { %v1457_v50 = vsel %vm1453_vm0, %v4302_v46, 0.0  ;;  %v1478_v51 = vmul.f32 %v4302_v46, %v4302_v46  ;;  %v4111_v52 = vpop.f32.mrb[4].mxu1  ;;  %1420 = vxpose.xlu0.b32.cont [2/8] (short) (narrow) %v4299_v31, 8 }
 0x223   : > { %v1458_v54 = vadd.f32 %v1457_v50, %v1456_v42  ;;  %v4303_v55 = vadd.f32 %v4111_v52, %v4083_v48  ;;  %v1392_v56 = vpop.f32.mrb[5].mxu1  ;;  %v1489_v63 = vsel %vm1453_vm0, %v1479_v49, 0.0 }
 0x224   : > { %v1487_v58 = vsel %vm1453_vm0, %v1478_v51, 0.0  ;;  %v4304_v59 = vadd.f32 %v1392_v56, %v1106_v53  ;;  %v4086_v62 = vpop.f32.mrb[14].mxu0 }
 0x225   : > { %v1488_v60 = vadd.f32 %v1487_v58, %v1486_v47  ;;  %v1460_v61 = vadd.f32 %v1459_v57, %v1458_v54  ;;  %v1481_v0 = vmul.f32 %v4303_v55, %v4303_v55  ;;  %v1116_v4 = vpop.f32.mrb[15].mxu0  ;;  %v1463_v9 = vsel %vm1453_vm0, %v4303_v55, 0.0 }
 0x226   : > { %v1461_v1 = vsel %vm1453_vm0, %v4304_v59, 0.0  ;;  %v1480_v2 = vmul.f32 %v4304_v59, %v4304_v59  ;;  %v4114_v3 = vpop.f32.mrb[6].mxu1  ;;  %1421 = vxpose.xlu0.b32.cont [3/8] (short) (narrow) %v4302_v46, 8 }
 0x227   : > { %v1462_v5 = vadd.f32 %v1461_v1, %v1460_v61  ;;  %v1490_v6 = vadd.f32 %v1489_v63, %v1488_v60  ;;  %v4305_v7 = vadd.f32 %v4114_v3, %v4086_v62  ;;  %v1402_v8 = vpop.f32.mrb[7].mxu1  ;;  %v1493_v14 = vsel %vm1453_vm0, %v1481_v0, 0.0 }
 0x228   : > { %v1491_v10 = vsel %vm1453_vm0, %v1480_v2, 0.0  ;;  %v4306_v11 = vadd.f32 %v1402_v8, %v1116_v4 }
 0x229   : > { %v1492_v12 = vadd.f32 %v1491_v10, %v1490_v6  ;;  %v1464_v13 = vadd.f32 %v1463_v9, %v1462_v5  ;;  %v1483_v15 = vmul.f32 %v4305_v7, %v4305_v7  ;;  %v1467_v16 = vsel %vm1453_vm0, %v4305_v7, 0.0 }
 0x22a   : > { %v1465_v18 = vsel %vm1453_vm0, %v4306_v11, 0.0  ;;  %v1482_v19 = vmul.f32 %v4306_v11, %v4306_v11  ;;  %1422 = vxpose.xlu0.b32.cont [4/8] (short) (narrow) %v4301_v43, 8 }
 0x22b   : > { %v1466_v20 = vadd.f32 %v1465_v18, %v1464_v13  ;;  %v1494_v21 = vadd.f32 %v1493_v14, %v1492_v12  ;;  %v1497_v24 = vsel %vm1453_vm0, %v1483_v15, 0.0 }
 0x22c   : > { %v1495_v17 = vsel %vm1453_vm0, %v1482_v19, 0.0 }
 0x22d   : > { %v1468_v22 = vadd.f32 %v1467_v16, %v1466_v20  ;;  %v1496_v23 = vadd.f32 %v1495_v17, %v1494_v21 }
 0x22e   : > { %1423 = vxpose.xlu0.b32.cont [5/8] (short) (narrow) %v4304_v59, 8 }
 0x22f   : > { %v1498_v25 = vadd.f32 %v1497_v24, %v1496_v23  ;;  %v1469_v27 = vrot.slane %v1468_v22, 4 }
 0x231   : > { %v1499_v41 = vrot.slane %v1498_v25, 4 }
 0x232   : > { %1424 = vxpose.xlu0.b32.cont [6/8] (short) (narrow) %v4303_v55, 8  ;;  %v5180_v55 = vadd.f32 %v1469_v27, %v1468_v22 }
 0x233   : > { %v5185_v59 = vadd.f32 %v1499_v41, %v1498_v25 }
 0x236   : > { %1425 = vxpose.xlu0.b32.cont [7/8] (short) (narrow) %v4306_v11, 8 }
 0x23a   : > { %1426 = vxpose.xlu0.b32.end [8/8] (short) (narrow) %v4305_v7, 8 }
 0x258   : > { %v5154_v26 = vpop.f32.mrb[16].mxu0 }
 0x259   : > { %v2775_v28 = vsel %vm1453_vm0, %v5154_v26, 0.0  ;;  %v2797_v29 = vmul.f32 %v5154_v26, %v5154_v26  ;;  %v5160_v31 = vpop.f32.mrb[17].mxu0 }
 0x25a   : > { %v4161_v30 = vpop.f32.mrb[8].mxu1  ;;  %v2774_v34 = vsel %vm1453_vm0, %v5160_v31, 0.0  ;;  %v2796_v35 = vmul.f32 %v5160_v31, %v5160_v31 }
 0x25b   : > { %v2117_v32 = vsel %vm1453_vm0, %v4161_v30, 0.0  ;;  %v2139_v33 = vmul.f32 %v4161_v30, %v4161_v30  ;;  %v2031_v36 = vpop.f32.mrb[9].mxu1  ;;  %v2805_v37 = vsel %vm1453_vm0, %v2797_v29, 0.0  ;;  %v2776_v38 = vadd.f32 %v2775_v28, %v2774_v34 }
 0x25c   : > { %v2116_v39 = vsel %vm1453_vm0, %v2031_v36, 0.0  ;;  %v2138_v40 = vmul.f32 %v2031_v36, %v2031_v36  ;;  %2078 = vxpose.xlu1.b32.start [1/8] (short) (narrow) %v2031_v36, 8  ;;  %v2804_v43 = vsel %vm1453_vm0, %v2796_v35, 0.0  ;;  %v5171_v45 = vpop.f32.mrb[18].mxu0 }
 0x25d   : > { %v2147_v42 = vsel %vm1453_vm0, %v2139_v33, 0.0  ;;  %v2118_v44 = vadd.f32 %v2117_v32, %v2116_v39  ;;  %v2806_v46 = vadd.f32 %v2805_v37, %v2804_v43  ;;  %v2799_v48 = vmul.f32 %v5171_v45, %v5171_v45  ;;  %v5176_v50 = vpop.f32.mrb[19].mxu0 }
 0x25e   : > { %v2146_v47 = vsel %vm1453_vm0, %v2138_v40, 0.0  ;;  %v4164_v49 = vpop.f32.mrb[10].mxu1  ;;  %v2777_v53 = vsel %vm1453_vm0, %v5176_v50, 0.0  ;;  %v2798_v57 = vmul.f32 %v5176_v50, %v5176_v50  ;;  %v2779_v60 = vsel %vm1453_vm0, %v5171_v45, 0.0 }
 0x25f   : > { %v2148_v51 = vadd.f32 %v2147_v42, %v2146_v47  ;;  %v2141_v52 = vmul.f32 %v4164_v49, %v4164_v49  ;;  %v2041_v54 = vpop.f32.mrb[11].mxu1  ;;  %v2778_v56 = vadd.f32 %v2777_v53, %v2776_v38  ;;  %v2809_v0 = vsel %vm1453_vm0, %v2799_v48, 0.0 }
 0x260   : > { %v2119_v58 = vsel %vm1453_vm0, %v2041_v54, 0.0  ;;  %2079 = vxpose.xlu1.b32.cont [2/8] (short) (narrow) %v4161_v30, 8  ;;  %v2140_v62 = vmul.f32 %v2041_v54, %v2041_v54  ;;  %v5189_v63 = vpop.f32.mrb[20].mxu0  ;;  %v2121_v1 = vsel %vm1453_vm0, %v4164_v49, 0.0  ;;  %v2807_v2 = vsel %vm1453_vm0, %v2798_v57, 0.0 }
 0x261   : > { %v2120_v61 = vadd.f32 %v2119_v58, %v2118_v44  ;;  %v5196_v4 = vpop.f32.mrb[21].mxu0  ;;  %v2780_v5 = vadd.f32 %v2779_v60, %v2778_v56  ;;  %v2151_v6 = vsel %vm1453_vm0, %v2141_v52, 0.0  ;;  %v2808_v7 = vadd.f32 %v2807_v2, %v2806_v46 }
 0x262   : > { %v5194_v3 = vpop.f32.mrb[12].mxu1  ;;  %v2149_v8 = vsel %vm1453_vm0, %v2140_v62, 0.0  ;;  %v2801_v9 = vmul.f32 %v5189_v63, %v5189_v63  ;;  %v2781_v13 = vsel %vm1453_vm0, %v5196_v4, 0.0  ;;  %v2800_v14 = vmul.f32 %v5196_v4, %v5196_v4 }
 0x263   : > { %v2051_v10 = vpop.f32.mrb[13].mxu1  ;;  %v2150_v11 = vadd.f32 %v2149_v8, %v2148_v51  ;;  %v2143_v12 = vmul.f32 %v5194_v3, %v5194_v3  ;;  %v2783_v15 = vsel %vm1453_vm0, %v5189_v63, 0.0  ;;  %v2782_v18 = vadd.f32 %v2781_v13, %v2780_v5 }
 0x264   : > { %2080 = vxpose.xlu1.b32.cont [3/8] (short) (narrow) %v2041_v54, 8  ;;  %v2810_v19 = vadd.f32 %v2809_v0, %v2808_v7  ;;  %v2122_v20 = vadd.f32 %v2121_v1, %v2120_v61  ;;  %v5210_v21 = vpop.f32.mrb[22].mxu0  ;;  %v2811_v16 = vsel %vm1453_vm0, %v2800_v14, 0.0  ;;  %v2123_v17 = vsel %vm1453_vm0, %v2051_v10, 0.0 }
 0x265   : > { %v2142_v22 = vmul.f32 %v2051_v10, %v2051_v10  ;;  %v2152_v23 = vadd.f32 %v2151_v6, %v2150_v11  ;;  %v5214_v25 = vpop.f32.mrb[23].mxu0  ;;  %v2813_v27 = vsel %vm1453_vm0, %v2801_v9, 0.0  ;;  %v2125_v28 = vsel %vm1453_vm0, %v5194_v3, 0.0 }
 0x266   : > { %v4170_v24 = vpop.f32.mrb[14].mxu1  ;;  %v2812_v29 = vadd.f32 %v2811_v16, %v2810_v19  ;;  %v2124_v30 = vadd.f32 %v2123_v17, %v2122_v20  ;;  %v2155_v33 = vsel %vm1453_vm0, %v2143_v12, 0.0  ;;  %v2787_v35 = vsel %vm1453_vm0, %v5210_v21, 0.0 }
 0x267   : > { %v2061_v32 = vpop.f32.mrb[15].mxu1  ;;  %v2153_v34 = vsel %vm1453_vm0, %v2142_v22, 0.0  ;;  %v2784_v36 = vadd.f32 %v2783_v15, %v2782_v18  ;;  %v2803_v38 = vmul.f32 %v5210_v21, %v5210_v21  ;;  %v2785_v39 = vsel %vm1453_vm0, %v5214_v25, 0.0 }
 0x268   : > { %2081 = vxpose.xlu1.b32.cont [4/8] (short) (narrow) %v4164_v49, 8  ;;  %v2154_v37 = vadd.f32 %v2153_v34, %v2152_v23  ;;  %v2802_v40 = vmul.f32 %v5214_v25, %v5214_v25  ;;  %v2145_v41 = vmul.f32 %v4170_v24, %v4170_v24  ;;  %v2814_v43 = vadd.f32 %v2813_v27, %v2812_v29 }
 0x269   : > { %v2786_v42 = vadd.f32 %v2785_v39, %v2784_v36  ;;  %v2126_v44 = vadd.f32 %v2125_v28, %v2124_v30  ;;  %v2127_v47 = vsel %vm1453_vm0, %v2061_v32, 0.0  ;;  %v2144_v48 = vmul.f32 %v2061_v32, %v2061_v32 }
 0x26a   : > { %v2815_v46 = vsel %vm1453_vm0, %v2802_v40, 0.0  ;;  %v2156_v49 = vadd.f32 %v2155_v33, %v2154_v37  ;;  %v1471_v54 = vrot.slane %v5180_v55, 2  ;;  %v2817_v56 = vsel %vm1453_vm0, %v2803_v38, 0.0 }
 0x26b   : > { %v2788_v51 = vadd.f32 %v2787_v35, %v2786_v42  ;;  %v2816_v52 = vadd.f32 %v2815_v46, %v2814_v43  ;;  %v2128_v53 = vadd.f32 %v2127_v47, %v2126_v44  ;;  %v2129_v57 = vsel %vm1453_vm0, %v4170_v24, 0.0 }
 0x26c   : > { %2082 = vxpose.xlu1.b32.cont [5/8] (short) (narrow) %v2051_v10, 8  ;;  %v2157_v58 = vsel %vm1453_vm0, %v2144_v48, 0.0  ;;  %v1501_v1 = vrot.slane %v5185_v59, 2  ;;  %v2159_v2 = vsel %vm1453_vm0, %v2145_v41, 0.0  ;;  %v1472_v9 = vadd.f32 %v1471_v54, %v5180_v55 }
 0x26d   : > { %v2789_v60 = vrot.slane %v2788_v51, 4  ;;  %v2818_v61 = vadd.f32 %v2817_v56, %v2816_v52  ;;  %v2130_v62 = vadd.f32 %v2129_v57, %v2128_v53  ;;  %v2158_v0 = vadd.f32 %v2157_v58, %v2156_v49 }
 0x26e   : > { %v1502_v14 = vadd.f32 %v1501_v1, %v5185_v59  ;;  %v1473_v16 = vrot.slane %v1472_v9, 1 }
 0x26f   : > { %v2790_v5 = vadd.f32 %v2789_v60, %v2788_v51  ;;  %v2819_v6 = vrot.slane %v2818_v61, 4  ;;  %v2131_v7 = vrot.slane %v2130_v62, 4  ;;  %v2160_v8 = vadd.f32 %v2159_v2, %v2158_v0 }
 0x270   : > { %2083 = vxpose.xlu1.b32.cont [6/8] (short) (narrow) %v5194_v3, 8  ;;  %v1503_v27 = vrot.slane %v1502_v14, 1  ;;  %v1474_v29 = vadd.f32 %v1473_v16, %v1472_v9 }
 0x271   : > { %v2791_v10 = vrot.slane %v2790_v5, 2  ;;  %v2820_v11 = vadd.f32 %v2819_v6, %v2818_v61  ;;  %v2132_v12 = vadd.f32 %v2131_v7, %v2130_v62  ;;  %v2161_v13 = vrot.slane %v2160_v8, 4 }
 0x272   : > { %v1504_v59 = vadd.f32 %v1503_v27, %v1502_v14 }
 0x273   : > { %v2792_v15 = vadd.f32 %v2791_v10, %v2790_v5  ;;  %v2821_v18 = vrot.slane %v2820_v11, 2  ;;  %v2133_v19 = vrot.slane %v2132_v12, 2  ;;  %v2162_v20 = vadd.f32 %v2161_v13, %v2160_v8 }
 0x274   : > { %2084 = vxpose.xlu1.b32.cont [7/8] (short) (narrow) %v2061_v32, 8 }
 0x275   : > { %v2822_v17 = vadd.f32 %v2821_v18, %v2820_v11  ;;  %v2134_v22 = vadd.f32 %v2133_v19, %v2132_v12  ;;  %v2163_v23 = vrot.slane %v2162_v20, 2  ;;  %v2793_v28 = vrot.slane %v2792_v15, 1 }
 0x277   : > { %v2135_v3 = vrot.slane %v2134_v22, 1  ;;  %v2164_v55 = vadd.f32 %v2163_v23, %v2162_v20  ;;  %v2823_v30 = vrot.slane %v2822_v17, 1  ;;  %v2794_v35 = vadd.f32 %v2793_v28, %v2792_v15 }
 0x278   : > { %2085 = vxpose.xlu1.b32.end [8/8] (short) (narrow) %v4170_v24, 8 }
 0x279   : > { %v2136_v33 = vadd.f32 %v2135_v3, %v2134_v22  ;;  %v2165_v34 = vrot.slane %v2164_v55, 1  ;;  %v2824_v38 = vadd.f32 %v2823_v30, %v2822_v17 }
 0x27b   : > { %v2166_v36 = vadd.f32 %v2165_v34, %v2164_v55  ;;  %v2137_v37 = vadd.f32 %v2136_v33, %v1474_v29 }
 0x27d   : > { %v2167_v32 = vadd.f32 %v2166_v36, %v1504_v59  ;;  %v5240_v39 = vadd.f32 %v2794_v35, %v2137_v37 }
 0x27f   : > { %v5242_v40 = vadd.f32 %v2824_v38, %v2167_v32 }
 0x29a   : > { %v4273_v41 = vpop.f32.mrb[16].mxu1 }
 0x29b   : > { %v3436_v24 = vsel %vm1453_vm0, %v4273_v41, 0.0  ;;  %v3458_v42 = vmul.f32 %v4273_v41, %v4273_v41  ;;  %v3351_v43 = vpop.f32.mrb[17].mxu1 }
 0x29c   : > { %v3435_v44 = vsel %vm1453_vm0, %v3351_v43, 0.0  ;;  %v3457_v46 = vmul.f32 %v3351_v43, %v3351_v43  ;;  %3398 = vxpose.xlu0.b32.start [1/8] (short) (narrow) %v3351_v43, 8 }
 0x29d   : > { %v3466_v47 = vsel %vm1453_vm0, %v3458_v42, 0.0  ;;  %v3437_v48 = vadd.f32 %v3436_v24, %v3435_v44 }
 0x29e   : > { %v3465_v49 = vsel %vm1453_vm0, %v3457_v46, 0.0  ;;  %v4276_v51 = vpop.f32.mrb[18].mxu1  ;;  %v1435_v52 = vpop.trf.xlu0 }
 0x29f   : > { %v3467_v53 = vadd.f32 %v3466_v47, %v3465_v49  ;;  %v3361_v54 = vpop.f32.mrb[19].mxu1  ;;  %1452 = vst.msk [vmem:[%s5252_s5] sm:$0xf] %vm1451_vm1, %v1435_v52  ;;  %v3460_v56 = vmul.f32 %v4276_v51, %v4276_v51  ;;  %v3440_v61 = vsel %vm1453_vm0, %v4276_v51, 0.0 }
 0x2a0   : > { %v3438_v57 = vsel %vm1453_vm0, %v3361_v54, 0.0  ;;  %v3459_v58 = vmul.f32 %v3361_v54, %v3361_v54  ;;  %3399 = vxpose.xlu0.b32.cont [2/8] (short) (narrow) %v4273_v41, 8 }
 0x2a1   : > { %v3439_v60 = vadd.f32 %v3438_v57, %v3437_v48  ;;  %v3470_v6 = vsel %vm1453_vm0, %v3460_v56, 0.0 }
 0x2a2   : > { %v3468_v62 = vsel %vm1453_vm0, %v3459_v58, 0.0  ;;  %v4279_v0 = vpop.f32.mrb[20].mxu1 }
 0x2a3   : > { %v3469_v1 = vadd.f32 %v3468_v62, %v3467_v53  ;;  %v3371_v2 = vpop.f32.mrb[21].mxu1  ;;  %v3441_v5 = vadd.f32 %v3440_v61, %v3439_v60  ;;  %v3462_v7 = vmul.f32 %v4279_v0, %v4279_v0  ;;  %v3444_v12 = vsel %vm1453_vm0, %v4279_v0, 0.0 }
 0x2a4   : > { %v3442_v8 = vsel %vm1453_vm0, %v3371_v2, 0.0  ;;  %v3461_v9 = vmul.f32 %v3371_v2, %v3371_v2  ;;  %3400 = vxpose.xlu0.b32.cont [3/8] (short) (narrow) %v3361_v54, 8 }
 0x2a5   : > { %v3443_v10 = vadd.f32 %v3442_v8, %v3441_v5  ;;  %v3471_v11 = vadd.f32 %v3470_v6, %v3469_v1  ;;  %v3474_v20 = vsel %vm1453_vm0, %v3462_v7, 0.0 }
 0x2a6   : > { %v3472_v13 = vsel %vm1453_vm0, %v3461_v9, 0.0  ;;  %v4282_v14 = vpop.f32.mrb[22].mxu1 }
 0x2a7   : > { %v3473_v15 = vadd.f32 %v3472_v13, %v3471_v11  ;;  %v3381_v18 = vpop.f32.mrb[23].mxu1  ;;  %v3445_v19 = vadd.f32 %v3444_v12, %v3443_v10  ;;  %v3464_v16 = vmul.f32 %v4282_v14, %v4282_v14  ;;  %v3448_v28 = vsel %vm1453_vm0, %v4282_v14, 0.0 }
 0x2a8   : > { %v3446_v17 = vsel %vm1453_vm0, %v3381_v18, 0.0  ;;  %v3463_v22 = vmul.f32 %v3381_v18, %v3381_v18  ;;  %3401 = vxpose.xlu0.b32.cont [4/8] (short) (narrow) %v4276_v51, 8 }
 0x2a9   : > { %v3447_v23 = vadd.f32 %v3446_v17, %v3445_v19  ;;  %v3475_v27 = vadd.f32 %v3474_v20, %v3473_v15  ;;  %v3478_v30 = vsel %vm1453_vm0, %v3464_v16, 0.0 }
 0x2aa   : > { %v3476_v3 = vsel %vm1453_vm0, %v3463_v22, 0.0 }
 0x2ab   : > { %v3449_v55 = vadd.f32 %v3448_v28, %v3447_v23  ;;  %v3477_v29 = vadd.f32 %v3476_v3, %v3475_v27 }
 0x2ac   : > { %3402 = vxpose.xlu0.b32.cont [5/8] (short) (narrow) %v3371_v2, 8 }
 0x2ad   : > { %v3450_v33 = vrot.slane %v3449_v55, 4  ;;  %v3479_v34 = vadd.f32 %v3478_v30, %v3477_v29 }
 0x2af   : > { %v3451_v59 = vadd.f32 %v3450_v33, %v3449_v55  ;;  %v3480_v35 = vrot.slane %v3479_v34, 4 }
 0x2b0   : > { %3403 = vxpose.xlu0.b32.cont [6/8] (short) (narrow) %v4279_v0, 8 }
 0x2b1   : > { %v3452_v36 = vrot.slane %v3451_v59, 2  ;;  %v3481_v37 = vadd.f32 %v3480_v35, %v3479_v34 }
 0x2b3   : > { %v3453_v38 = vadd.f32 %v3452_v36, %v3451_v59  ;;  %v3482_v32 = vrot.slane %v3481_v37, 2 }
 0x2b4   : > { %3404 = vxpose.xlu0.b32.cont [7/8] (short) (narrow) %v3381_v18, 8 }
 0x2b5   : > { %v3454_v41 = vrot.slane %v3453_v38, 1  ;;  %v3483_v24 = vadd.f32 %v3482_v32, %v3481_v37 }
 0x2b7   : > { %v3455_v42 = vadd.f32 %v3454_v41, %v3453_v38  ;;  %v3484_v43 = vrot.slane %v3483_v24, 1 }
 0x2b8   : > { %3405 = vxpose.xlu0.b32.end [8/8] (short) (narrow) %v4282_v14, 8 }
 0x2b9   : > { %v3456_v44 = vadd.f32 %v3455_v42, %v5240_v39  ;;  %v3485_v46 = vadd.f32 %v3484_v43, %v3483_v24 }
 0x2bb   : > { %v3486_v47 = vadd.f32 %v3485_v46, %v5242_v40 }
 0x2bc   : > { %2741 = vxpose.xlu0.b32.start [1/8] (short) (narrow) %v5160_v31, 8 }
 0x2bd   : > { %v3488_v48 = vsel %vm3487_vm8, %v3456_v44, %v3486_v47 }
 0x2be   : > { %3490 = vst.msk [vmem:[%s201_s7] sm:$0x3] %vm3489_vm9, %v3488_v48 }
 0x2c0   : > { %2742 = vxpose.xlu0.b32.cont [2/8] (short) (narrow) %v5154_v26, 8 }
 0x2c4   : > { %2743 = vxpose.xlu0.b32.cont [3/8] (short) (narrow) %v5176_v50, 8 }
 0x2c8   : > { %2744 = vxpose.xlu0.b32.cont [4/8] (short) (narrow) %v5171_v45, 8 }
 0x2cc   : > { %2745 = vxpose.xlu0.b32.cont [5/8] (short) (narrow) %v5196_v4, 8 }
 0x2d0   : > { %2746 = vxpose.xlu0.b32.cont [6/8] (short) (narrow) %v5189_v63, 8 }
 0x2d4   : > { %2747 = vxpose.xlu0.b32.cont [7/8] (short) (narrow) %v5214_v25, 8 }
 0x2d8   : > { %2748 = vxpose.xlu0.b32.end [8/8] (short) (narrow) %v5210_v21, 8 }
 0x2dc   : > { %v2094_v31 = vpop.trf.xlu1 }
 0x2dd   : > { %2111 = vrot.lane.b32.xlu1 %v2094_v31, %s4563_s8 }
 0x2de   : > { %4479 = shalt.err (!%p4476_p3)
}
 0x2df   : > { %s4480_s28 = scalar_lea.hbm %s5284_s13, 32  ;;  %s4484_s7 = scalar_lea.hbm %s5361_s4, 64 }
 0x2e0   : > { %p4481_p4 = scmp.ne.s32.totalorder %s5284_s13, %s4480_s28  ;;  %p4485_p9 = scmp.lt.u32.totalorder %s5284_s13, %s5361_s4 }
 0x2e1   : > { %p4486_p10 = scmp.lt.u32.totalorder %s4484_s7, %s4480_s28  ;;  %p4488_p12 = scmp.lt.u32.totalorder %s4480_s28, %s5284_s13 }
 0x2e2   : > { %p4482_p7 = pnand %p4481_p4, %p4629_p5 }
 0x2e3   : > { %p4487_p11 = por %p4486_p10, %p4485_p9 }
 0x2e4   : > { %p4483_p8 = pneg %p4482_p7 }
 0x2e5   : > { %p4489_p13 = por %p4488_p12, %p4487_p11 }
 0x2e7   : > { %p4490_p0 = pnand %p4489_p13, %p4483_p8 }
 0x2e9   : > { %4493 = shalt.err (!%p4490_p0)
}
 0x2ea   : > { %4421 = dma.vmem_to_hbm [thread:$0]  (%p4629_p5), %s3525_s10, 32, %s5284_s13, %s3497_s14   ;;  %vm2114_vm10 = vcmask 1043968  }
 0x2eb   : > { %s3810_s12 = sshll.u32 %s4612_s19, 7  ;;  %s3511_s20 = sshll.u32 %s5252_s5, 4  ;;  %s5315_s20 = int_to_ptr.vmem [resolvable:$true] %s3511_s20 }
 0x2ec   : > { %s5313_s27 = scalar_lea.hbm %s5360_s3, %s3810_s12  ;;  %s4494_s10 = scalar_lea.vmem %s5315_s20, 128 }
 0x2ed   : > { %p4495_p1 = scmp.ne.s32.totalorder %s5315_s20, %s4494_s10  ;;  %s4565_s19 = smov [#allocation3]  }
 0x2ee   : > { %s4498_s13 = sshll.u32 %s4565_s19, 4  ;;  %s4499_s13 = int_to_ptr.vmem [resolvable:$false] %s4498_s13 }
 0x2ef   : > { %p4496_p2 = pnand %p4495_p1, %p4629_p5  ;;  %s4500_s14 = scalar_lea.vmem %s4499_s13, 256 }
 0x2f0   : > { %p4501_p4 = scmp.lt.s32.totalorder %s5315_s20, %s4499_s13  ;;  %p4502_p7 = scmp.lt.s32.totalorder %s4500_s14, %s4494_s10 }
 0x2f1   : > { %p4497_p3 = pneg %p4496_p2 }
 0x2f2   : > { %p4503_p8 = por %p4502_p7, %p4501_p4 }
 0x2f4   : > { %p4504_p9 = pnand %p4503_p8, %p4497_p3 }
 0x31c   : > { %v3414_v26 = vpop.trf.xlu0 }
 0x31d   : > { %3431 = vrot.lane.b32.xlu1 %v3414_v26, %s4563_s8  ;;  %s3492_s8 = scalar_lea.sflag [#allocation4], %s5245_s29 }
 0x33c   : > { %v2757_v45 = vpop.trf.xlu0 }
 0x33d   : > { %2773 = vst.msk [vmem:[%s5252_s5 + $0x4] sm:$0xf] %vm1451_vm1, %v2757_v45 }
 0x34f   : > { %v2112_v50 = vpop.permute.xlu1 %2111 }
 0x350   : > { %2115 = vst.msk [vmem:[%s5252_s5] sm:$0xf] %vm2114_vm10, %v2112_v50 }
 0x38f   : > { %v3432_v63 = vpop.permute.xlu1 %3431 }
 0x390   : > { %3434 = vst.msk [vmem:[%s5252_s5 + $0x4] sm:$0xf] %vm2114_vm10, %v3432_v63 }
 0x391   : > { %4507 = shalt.err (!%p4504_p9)
}
 0x392   : > { %s4508_s29 = scalar_lea.hbm %s5313_s27, 128  ;;  %s4512_s30 = scalar_lea.hbm %s5360_s3, 256 }
 0x393   : > { %p4509_p10 = scmp.ne.s32.totalorder %s5313_s27, %s4508_s29  ;;  %p4513_p13 = scmp.lt.u32.totalorder %s5313_s27, %s5360_s3 }
 0x394   : > { %p4514_p0 = scmp.lt.u32.totalorder %s4512_s30, %s4508_s29  ;;  %p4516_p2 = scmp.lt.u32.totalorder %s4508_s29, %s5313_s27 }
 0x395   : > { %p4510_p11 = pnand %p4509_p10, %p4629_p5 }
 0x396   : > { %p4515_p1 = por %p4514_p0, %p4513_p13 }
 0x397   : > { %p4511_p12 = pneg %p4510_p11 }
 0x398   : > { %p4517_p3 = por %p4516_p2, %p4515_p1 }
 0x39a   : > { %p4518_p4 = pnand %p4517_p3, %p4511_p12 }
 0x39c   : > { %4521 = shalt.err (!%p4518_p4)
}
 0x39d   : > { %4420 = dma.vmem_to_hbm [thread:$0]  (%p4629_p5), %s5315_s20, 128, %s5313_s27, %s3492_s8  }
 0x39e PF: > { %p4431_p7 = scmp.ge.s32.totalorder %s4560_s18, 2  ;;  %s3536_s9 = sand.u32 1, %s4548_s15  }
 0x39f   : > { %s3537_s11 = scalar_lea.sflag [#allocation4], %s3536_s9 }
 0x3a0   : > { %p4425_p8 = pnand %p4431_p7, %p4633_p6 }
 0x3a2   : > { %4539 = dma.done.wait (!%p4425_p8), %s3537_s11, 128  }
 0x3a3   : > { %4541 = vsyncadd (!%p4425_p8), %s3537_s11, 4294967168  ;;  %s3546_s12 = scalar_lea.sflag [#allocation6], %s3536_s9 }
 0x3a4   : > { %4543 = dma.done.wait (!%p4425_p8), %s3546_s12, 32  }
 0x3a5   : > { %4545 = vsyncadd (!%p4425_p8), %s3546_s12, 4294967264  ;;  %p18_p5 = scmp.ge.s32.totalorder %s4616_s21, 4   ;;  %s5364_s15 = smov %s4552_s16 }
 0x3a6   : > { %s5365_s16 = smov %s4556_s17  ;;  %s5366_s17 = smov %s4627_s24 }
 0x3a7   : > { %s5367_s18 = smov %s4616_s21  ;;  %20 = sbr.rel (!%p18_p5) target bundleno = 5 (0x5), region = 104 }
 0x3ae   :  { %3551 = vsyncpa [#allocation4], 1 }
 0x3af   :  { %3553 = vsyncpa [#allocation4 + $0x1], 1 }
 0x3b0   :  { %3554 = vsyncpa [#allocation6], 1 }
 0x3b1   :  { %3556 = vsyncpa [#allocation6 + $0x1], 1 }

</bundles_post_ra>
